<compile_context>
chip_gen: v6e
topology: v6e:2x2x1
jax: 0.10.0
libtpu: 0.0.40
codegen_flags: <defaults>
</compile_context>

<pallas_src>
import jax
import jax.numpy as jnp
from jax.experimental import pallas as pl
from jax.experimental.pallas import tpu as pltpu


def _round_up(x, m):
    return ((x + m - 1) // m) * m


def _recip(x):
    # EUP approximate reciprocal + one Newton-Raphson refinement step (2 cheap
    # VALU ops on tiny (TB,Nq,1)/(TB,1,Nv) vectors): near-f32-exact softmax
    # normalization without a VALU divide sweep.
    y = pl.reciprocal(x, approx=True)
    return y * (2.0 - x * y)


def _co_attention_kernel(q_ref, v_ref, wq_ref, bq_ref, wv_ref, bv_ref,
                         vhat_ref, qhat_ref):
    TB, Nq, Dq = q_ref.shape
    _, Nv, Dv = v_ref.shape
    Hdp = wq_ref.shape[1]

    Q = q_ref[...]                      # (TB, Nq, Dq)
    V = v_ref[...]                      # (TB, Nv, Dv)

    # ---- Linear projections.  When N is a multiple of 8 the (TB, N, D) ->
    # (TB*N, D) reshape only collapses sublane groups (layout-preserving), so
    # each projection is a single fused MXU matmul; otherwise fall back to the
    # batched form to avoid a per-step relayout copy.
    if Nq % 8 == 0:
        Q_proj = (jnp.dot(Q.reshape(TB * Nq, Dq), wq_ref[...],
                          preferred_element_type=jnp.float32)
                  + bq_ref[...]).reshape(TB, Nq, Hdp)
    else:
        Q_proj = (jnp.einsum('bnd,dh->bnh', Q, wq_ref[...],
                             preferred_element_type=jnp.float32)
                  + bq_ref[...])
    if Nv % 8 == 0:
        V_proj = (jnp.dot(V.reshape(TB * Nv, Dv), wv_ref[...],
                          preferred_element_type=jnp.float32)
                  + bv_ref[...]).reshape(TB, Nv, Hdp)
    else:
        V_proj = (jnp.einsum('bnd,dh->bnh', V, wv_ref[...],
                             preferred_element_type=jnp.float32)
                  + bv_ref[...])

    # ---- Affinity H = tanh(Q_proj @ V_proj^T); last (lane) dims contracted.
    # TODO(synk): verify with pl.lower_as_mlir that this contraction does not
    # insert a per-batch XLU transpose of V_proj; if it does, feed the MXU in
    # trans_b form instead.
    H = jnp.tanh(jnp.einsum('bqh,bvh->bqv', Q_proj, V_proj,
                            preferred_element_type=jnp.float32))  # (TB,Nq,Nv)

    # ---- Single exp sweep (tanh bounds H to [-1, 1]: no max-shift needed; the
    # same exp(H) feeds both softmax normalizations).
    E = jnp.exp(H)                                           # (TB, Nq, Nv)
    inv_lv = _recip(jnp.sum(E, axis=2, keepdims=True))       # (TB, Nq, 1)
    inv_lq = _recip(jnp.sum(E, axis=1, keepdims=True))       # (TB, 1, Nv)

    # ---- v_hat = sum_q (A_v @ V) = sum_v (sum_q A_v[:, v]) * V[v, :]
    w_v = jnp.sum(E * inv_lv, axis=1)                        # (TB, Nv)
    vhat_ref[...] = jnp.sum(w_v[:, :, None] * V.astype(jnp.float32),
                            axis=1).astype(vhat_ref.dtype)

    # ---- q_hat = sum_v (A_q @ Q) = sum_q (sum_v A_q[v, :]) * Q[q, :]
    s_q = jnp.sum(E * inv_lq, axis=2)                        # (TB, Nq)
    qhat_ref[...] = jnp.sum(s_q[:, :, None] * Q.astype(jnp.float32),
                            axis=1).astype(qhat_ref.dtype)


def _pick_tb(B, Nq, Nv, Dq, Dv, Hdp):
    """Batch-tile size + explicit scoped-VMEM limit."""
    n_rows = max(Nq, Nv, 1)
    # Target ~256 MXU rows per projection matmul; multiple of 8 (sublane-dense).
    TB = max(8, _round_up(int(pl.cdiv(256, n_rows)), 8))

    def vmem_bytes(tb):
        f32 = 4
        io = 2 * tb * (Nq * Dq + Nv * Dv) * f32            # double-buffered Q/V
        io += 2 * 2 * tb * (Dq + Dv) * f32                 # double-buffered outputs
        wts = ((Dq + Dv) * Hdp + 2 * Hdp) * f32 * 2        # weights/biases (2 bufs)
        inter = tb * ((Nq + Nv) * Hdp                      # projections
                      + 3 * Nq * Nv                        # H, E, E*inv
                      + 2 * (Nq + Nv)) * f32               # norms / pooled weights
        return io + wts + inter

    budget = 24 * 1024 * 1024                              # conservative vs v7x 64 MiB
    while TB > 8 and vmem_bytes(TB) > budget:
        TB -= 8
    # Keep >= 2 grid steps when the batch allows so both v7x TensorCores work.
    while TB > 8 and _round_up(B, TB) // TB < 2:
        TB = max(8, (TB // 2) // 8 * 8)

    vmem_limit = int(min(56 * 1024 * 1024,
                         max(32 * 1024 * 1024, 2 * vmem_bytes(TB))))
    return TB, vmem_limit


def co_attention(V, Q, Wq, bq, Wv, bv):
    """V: (B, Nv, Dv), Q: (B, Nq, Dq) -> (v_hat (B, Dv), q_hat (B, Dq)).

    Wq: (Dq, Hd), Wv: (Dv, Hd) stored as (in, out), so x @ W + b matches the
    PyTorch nn.Linear forward (x @ W_torch.T + b).
    """
    B, Nv, Dv = V.shape
    Bq, Nq, Dq = Q.shape
    assert B == Bq
    Hd = Wq.shape[1]
    assert Wq.shape == (Dq, Hd) and Wv.shape == (Dv, Hd)

    # Only the small, grid-resident weights/biases get lane padding (Hd -> 128k).
    # Zero-padded columns are numerically inert.  Q/V stay unpadded in HBM.
    Hdp = _round_up(Hd, 128)
    Wq_p = jnp.zeros((Dq, Hdp), Wq.dtype).at[:, :Hd].set(Wq)
    Wv_p = jnp.zeros((Dv, Hdp), Wv.dtype).at[:, :Hd].set(Wv)
    bq_p = jnp.zeros((1, Hdp), bq.dtype).at[0, :Hd].set(bq.reshape(-1))
    bv_p = jnp.zeros((1, Hdp), bv.dtype).at[0, :Hd].set(bv.reshape(-1))

    TB, vmem_limit = _pick_tb(B, Nq, Nv, Dq, Dv, Hdp)
    Bp = _round_up(B, TB)
    if Bp != B:
        Q_in = jnp.zeros((Bp, Nq, Dq), Q.dtype).at[:B].set(Q)
        V_in = jnp.zeros((Bp, Nv, Dv), V.dtype).at[:B].set(V)
    else:
        Q_in, V_in = Q, V

    grid_spec = pltpu.PrefetchScalarGridSpec(
        num_scalar_prefetch=0,
        grid=(Bp // TB,),
        in_specs=[
            pl.BlockSpec((TB, Nq, Dq), lambda b: (b, 0, 0)),   # Q block (unpadded)
            pl.BlockSpec((TB, Nv, Dv), lambda b: (b, 0, 0)),   # V block (unpadded)
            # Grid-invariant weights/biases stay resident in VMEM.
            # TODO(synk): if Dq/Dv/Hd grow to ~1K, add pipeline_mode=pl.Buffered(1)
            # here to drop their second buffer (matters against v7x's 64 MiB VMEM).
            pl.BlockSpec((Dq, Hdp), lambda b: (0, 0)),         # Wq
            pl.BlockSpec((1, Hdp), lambda b: (0, 0)),          # bq
            pl.BlockSpec((Dv, Hdp), lambda b: (0, 0)),         # Wv
            pl.BlockSpec((1, Hdp), lambda b: (0, 0)),          # bv
        ],
        out_specs=[
            pl.BlockSpec((TB, Dv), lambda b: (b, 0)),          # v_hat
            pl.BlockSpec((TB, Dq), lambda b: (b, 0)),          # q_hat
        ],
    )

    # Advisory cost estimate so XLA can overlap neighbouring ops with the kernel.
    flops = 2 * Bp * ((Nq * Dq + Nv * Dv) * Hdp + Nq * Nv * Hdp)
    transcendentals = 2 * Bp * Nq * Nv                         # tanh + one exp sweep
    bytes_accessed = 4 * (Bp * (Nq * Dq + Nv * Dv + Dq + Dv)
                          + (Dq + Dv + 2) * Hdp)

    v_hat, q_hat = pl.pallas_call(
        _co_attention_kernel,
        out_shape=(
            jax.ShapeDtypeStruct((Bp, Dv), V.dtype),
            jax.ShapeDtypeStruct((Bp, Dq), Q.dtype),
        ),
        grid_spec=grid_spec,
        compiler_params=pltpu.CompilerParams(
            dimension_semantics=("parallel",),
            vmem_limit_bytes=vmem_limit,
        ),
        cost_estimate=pl.CostEstimate(
            flops=int(flops),
            transcendentals=int(transcendentals),
            bytes_accessed=int(bytes_accessed),
        ),
    )(Q_in, V_in, Wq_p, bq_p, Wv_p, bv_p)

    return v_hat[:B], q_hat[:B]


def _reference(V, Q, Wq, bq, Wv, bv):
    """Pure-JAX reference mirroring the PyTorch forward."""
    Q_proj = Q @ Wq + bq
    V_proj = V @ Wv + bv
    H = jnp.tanh(jnp.einsum("bqh,bvh->bqv", Q_proj, V_proj))
    A_v = jax.nn.softmax(H, axis=2)
    V_tilde = jnp.einsum("bqv,bvd->bqd", A_v, V)
    A_q = jax.nn.softmax(jnp.swapaxes(H, 1, 2), axis=2)
    Q_tilde = jnp.einsum("bvq,bqd->bvd", A_q, Q)
    return V_tilde.sum(axis=1), Q_tilde.sum(axis=1)


if __name__ == "__main__":
    # Small shapes consistent with the module's forward:
    #   Q: (B, Nq, q_dim), V: (B, Nv, v_dim)
    # B=12 exercises batch padding and the multi-grid-step (>= 2 TC) path.
    B, Nq, Nv = 12, 8, 16
    q_dim, v_dim, hidden_dim = 48, 32, 64

    key = jax.random.PRNGKey(0)
    kq, kv, kwq, kbq, kwv, kbv = jax.random.split(key, 6)

    Q = jax.random.normal(kq, (B, Nq, q_dim), dtype=jnp.float32)
    V = jax.random.normal(kv, (B, Nv, v_dim), dtype=jnp.float32)

    # Deterministic "Linear" parameters, stored as (in, out).
    Wq = jax.random.normal(kwq, (q_dim, hidden_dim), dtype=jnp.float32) * 0.05
    bq = jax.random.normal(kbq, (hidden_dim,), dtype=jnp.float32) * 0.05
    Wv = jax.random.normal(kwv, (v_dim, hidden_dim), dtype=jnp.float32) * 0.05
    bv = jax.random.normal(kbv, (hidden_dim,), dtype=jnp.float32) * 0.05

    v_hat, q_hat = co_attention(V, Q, Wq, bq, Wv, bv)
    v_hat, q_hat = jax.block_until_ready((v_hat, q_hat))

    v_ref, q_ref = _reference(V, Q, Wq, bq, Wv, bv)
    assert v_hat.shape == (B, v_dim) and q_hat.shape == (B, q_dim)
    # Approx reciprocal is refined with one Newton step -> near-f32 accuracy.
    assert jnp.allclose(v_hat, v_ref, atol=1e-4, rtol=1e-4)
    assert jnp.allclose(q_hat, q_ref, atol=1e-4, rtol=1e-4)

    print("KERNEL_OK")
</pallas_src>

<mosaic_0001>
module attributes {stable_mosaic.version = 11 : i64} {
  func.func @_co_attention_kernel(%arg0: i32, %arg1: memref<8x8x48xf32, #tpu.memory_space<vmem>>, %arg2: memref<8x16x32xf32, #tpu.memory_space<vmem>>, %arg3: memref<48x128xf32, #tpu.memory_space<vmem>>, %arg4: memref<1x128xf32, #tpu.memory_space<vmem>>, %arg5: memref<32x128xf32, #tpu.memory_space<vmem>>, %arg6: memref<1x128xf32, #tpu.memory_space<vmem>>, %arg7: memref<8x32xf32, #tpu.memory_space<vmem>>, %arg8: memref<8x48xf32, #tpu.memory_space<vmem>>) attributes {dimension_semantics = [#tpu.dimension_semantics<parallel>], iteration_bounds = array<i64: 2>, scalar_prefetch = 0 : i64, scratch_operands = 0 : i64, tpu.core_type = #tpu.core_type<tc>, window_params = [{transform_indices = @transform_0, window_bounds = array<i64: 8, 8, 48>}, {transform_indices = @transform_1, window_bounds = array<i64: 8, 16, 32>}, {pipeline_mode = #tpu.pipeline_mode<synchronous>, transform_indices = @transform_2, window_bounds = array<i64: 48, 128>}, {pipeline_mode = #tpu.pipeline_mode<synchronous>, transform_indices = @transform_3, window_bounds = array<i64: 1, 128>}, {pipeline_mode = #tpu.pipeline_mode<synchronous>, transform_indices = @transform_4, window_bounds = array<i64: 32, 128>}, {pipeline_mode = #tpu.pipeline_mode<synchronous>, transform_indices = @transform_5, window_bounds = array<i64: 1, 128>}, {transform_indices = @transform_6, window_bounds = array<i64: 8, 32>}, {transform_indices = @transform_7, window_bounds = array<i64: 8, 48>}]} {
    %c0 = arith.constant 0 : index
    %c0_0 = arith.constant 0 : index
    %c0_1 = arith.constant 0 : index
    %0 = vector.load %arg1[%c0, %c0_0, %c0_1] : memref<8x8x48xf32, #tpu.memory_space<vmem>>, vector<8x8x48xf32>
    %c0_2 = arith.constant 0 : index
    %c0_3 = arith.constant 0 : index
    %c0_4 = arith.constant 0 : index
    %1 = vector.load %arg2[%c0_2, %c0_3, %c0_4] : memref<8x16x32xf32, #tpu.memory_space<vmem>>, vector<8x16x32xf32>
    %2 = vector.shape_cast %0 : vector<8x8x48xf32> to vector<64x48xf32>
    %c0_5 = arith.constant 0 : index
    %c0_6 = arith.constant 0 : index
    %3 = vector.load %arg3[%c0_5, %c0_6] : memref<48x128xf32, #tpu.memory_space<vmem>>, vector<48x128xf32>
    %cst = arith.constant dense<0.000000e+00> : vector<64x128xf32>
    %4 = tpu.matmul %2, %3, %cst {dimension_numbers = #tpu.dot_dimension_numbers<[1], [0], [0], [1], [0, 0, 1, 1], [], []>} : vector<64x48xf32>, vector<48x128xf32>, vector<64x128xf32> -> vector<64x128xf32>
    %c0_7 = arith.constant 0 : index
    %c0_8 = arith.constant 0 : index
    %5 = vector.load %arg4[%c0_7, %c0_8] : memref<1x128xf32, #tpu.memory_space<vmem>>, vector<1x128xf32>
    %6 = vector.broadcast %5 : vector<1x128xf32> to vector<64x128xf32>
    %7 = arith.addf %4, %6 : vector<64x128xf32>
    %8 = vector.shape_cast %7 : vector<64x128xf32> to vector<8x8x128xf32>
    %9 = vector.shape_cast %1 : vector<8x16x32xf32> to vector<128x32xf32>
    %c0_9 = arith.constant 0 : index
    %c0_10 = arith.constant 0 : index
    %10 = vector.load %arg5[%c0_9, %c0_10] : memref<32x128xf32, #tpu.memory_space<vmem>>, vector<32x128xf32>
    %cst_11 = arith.constant dense<0.000000e+00> : vector<128x128xf32>
    %11 = tpu.matmul %9, %10, %cst_11 {dimension_numbers = #tpu.dot_dimension_numbers<[1], [0], [0], [1], [0, 0, 1, 1], [], []>} : vector<128x32xf32>, vector<32x128xf32>, vector<128x128xf32> -> vector<128x128xf32>
    %c0_12 = arith.constant 0 : index
    %c0_13 = arith.constant 0 : index
    %12 = vector.load %arg6[%c0_12, %c0_13] : memref<1x128xf32, #tpu.memory_space<vmem>>, vector<1x128xf32>
    %13 = vector.broadcast %12 : vector<1x128xf32> to vector<128x128xf32>
    %14 = arith.addf %11, %13 : vector<128x128xf32>
    %15 = vector.shape_cast %14 : vector<128x128xf32> to vector<8x16x128xf32>
    "tpu.trace_start"() <{level = 10 : i32, message = "bqh,bvh->bqv"}> : () -> ()
    %cst_14 = arith.constant dense<0.000000e+00> : vector<8x8x16xf32>
    %16 = tpu.matmul %8, %15, %cst_14 {dimension_numbers = #tpu.dot_dimension_numbers<[2], [2], [1], [1], [0, 0, 0, 1, 1, 1], [0], [0]>} : vector<8x8x128xf32>, vector<8x16x128xf32>, vector<8x8x16xf32> -> vector<8x8x16xf32>
    "tpu.trace_stop"() : () -> ()
    %17 = math.tanh %16 : vector<8x8x16xf32>
    %18 = math.exp %17 : vector<8x8x16xf32>
    %cst_15 = arith.constant dense<0.000000e+00> : vector<8x8xf32>
    %19 = vector.multi_reduction <add>, %18, %cst_15 [2] : vector<8x8x16xf32> to vector<8x8xf32>
    %20 = vector.shape_cast %19 : vector<8x8xf32> to vector<8x8x1xf32>
    %21 = tpu.reciprocal %20 {approx = true} : vector<8x8x1xf32> -> vector<8x8x1xf32>
    %22 = arith.mulf %20, %21 : vector<8x8x1xf32>
    %cst_16 = arith.constant 2.000000e+00 : f32
    %23 = vector.broadcast %cst_16 : f32 to vector<8x8x1xf32>
    %24 = arith.subf %23, %22 : vector<8x8x1xf32>
    %25 = arith.mulf %21, %24 : vector<8x8x1xf32>
    %cst_17 = arith.constant dense<0.000000e+00> : vector<8x16xf32>
    %26 = vector.multi_reduction <add>, %18, %cst_17 [1] : vector<8x8x16xf32> to vector<8x16xf32>
    %27 = vector.shape_cast %26 : vector<8x16xf32> to vector<8x1x16xf32>
    %28 = tpu.reciprocal %27 {approx = true} : vector<8x1x16xf32> -> vector<8x1x16xf32>
    %29 = arith.mulf %27, %28 : vector<8x1x16xf32>
    %cst_18 = arith.constant 2.000000e+00 : f32
    %30 = vector.broadcast %cst_18 : f32 to vector<8x1x16xf32>
    %31 = arith.subf %30, %29 : vector<8x1x16xf32>
    %32 = arith.mulf %28, %31 : vector<8x1x16xf32>
    %33 = vector.broadcast %25 : vector<8x8x1xf32> to vector<8x8x16xf32>
    %34 = arith.mulf %18, %33 : vector<8x8x16xf32>
    %cst_19 = arith.constant dense<0.000000e+00> : vector<8x16xf32>
    %35 = vector.multi_reduction <add>, %34, %cst_19 [1] : vector<8x8x16xf32> to vector<8x16xf32>
    %36 = vector.shape_cast %35 : vector<8x16xf32> to vector<8x16x1xf32>
    %37 = vector.broadcast %36 : vector<8x16x1xf32> to vector<8x16x32xf32>
    %38 = arith.mulf %37, %1 : vector<8x16x32xf32>
    %cst_20 = arith.constant dense<0.000000e+00> : vector<8x32xf32>
    %39 = vector.multi_reduction <add>, %38, %cst_20 [1] : vector<8x16x32xf32> to vector<8x32xf32>
    %c0_21 = arith.constant 0 : index
    %c0_22 = arith.constant 0 : index
    %40 = vector.load %arg7[%c0_21, %c0_22] : memref<8x32xf32, #tpu.memory_space<vmem>>, vector<8x32xf32>
    tpu.vector_store %arg7[%c0_21, %c0_22], %39 {strides = array<i32>} : memref<8x32xf32, #tpu.memory_space<vmem>>, vector<8x32xf32>,
    %41 = vector.broadcast %32 : vector<8x1x16xf32> to vector<8x8x16xf32>
    %42 = arith.mulf %18, %41 : vector<8x8x16xf32>
    %cst_23 = arith.constant dense<0.000000e+00> : vector<8x8xf32>
    %43 = vector.multi_reduction <add>, %42, %cst_23 [2] : vector<8x8x16xf32> to vector<8x8xf32>
    %44 = vector.shape_cast %43 : vector<8x8xf32> to vector<8x8x1xf32>
    %45 = vector.broadcast %44 : vector<8x8x1xf32> to vector<8x8x48xf32>
    %46 = arith.mulf %45, %0 : vector<8x8x48xf32>
    %cst_24 = arith.constant dense<0.000000e+00> : vector<8x48xf32>
    %47 = vector.multi_reduction <add>, %46, %cst_24 [1] : vector<8x8x48xf32> to vector<8x48xf32>
    %c0_25 = arith.constant 0 : index
    %c0_26 = arith.constant 0 : index
    %48 = vector.load %arg8[%c0_25, %c0_26] : memref<8x48xf32, #tpu.memory_space<vmem>>, vector<8x48xf32>
    tpu.vector_store %arg8[%c0_25, %c0_26], %47 {strides = array<i32>} : memref<8x48xf32, #tpu.memory_space<vmem>>, vector<8x48xf32>,
    return
  }
  func.func @transform_0(%arg0: i32) -> (i32, i32, i32) {
    %c0_i32 = arith.constant 0 : i32
    %c0_i32_0 = arith.constant 0 : i32
    %c0_i32_1 = arith.constant 0 : i32
    return %arg0, %c0_i32, %c0_i32_0 : i32, i32, i32
  }
  func.func @transform_1(%arg0: i32) -> (i32, i32, i32) {
    %c0_i32 = arith.constant 0 : i32
    %c0_i32_0 = arith.constant 0 : i32
    %c0_i32_1 = arith.constant 0 : i32
    return %arg0, %c0_i32, %c0_i32_0 : i32, i32, i32
  }
  func.func @transform_2(%arg0: i32) -> (i32, i32) {
    %c0_i32 = arith.constant 0 : i32
    %c0_i32_0 = arith.constant 0 : i32
    %c0_i32_1 = arith.constant 0 : i32
    return %c0_i32, %c0_i32_0 : i32, i32
  }
  func.func @transform_3(%arg0: i32) -> (i32, i32) {
    %c0_i32 = arith.constant 0 : i32
    %c0_i32_0 = arith.constant 0 : i32
    %c0_i32_1 = arith.constant 0 : i32
    return %c0_i32, %c0_i32_0 : i32, i32
  }
  func.func @transform_4(%arg0: i32) -> (i32, i32) {
    %c0_i32 = arith.constant 0 : i32
    %c0_i32_0 = arith.constant 0 : i32
    %c0_i32_1 = arith.constant 0 : i32
    return %c0_i32, %c0_i32_0 : i32, i32
  }
  func.func @transform_5(%arg0: i32) -> (i32, i32) {
    %c0_i32 = arith.constant 0 : i32
    %c0_i32_0 = arith.constant 0 : i32
    %c0_i32_1 = arith.constant 0 : i32
    return %c0_i32, %c0_i32_0 : i32, i32
  }
  func.func @transform_6(%arg0: i32) -> (i32, i32) {
    %c0_i32 = arith.constant 0 : i32
    %c0_i32_0 = arith.constant 0 : i32
    return %arg0, %c0_i32 : i32, i32
  }
  func.func @transform_7(%arg0: i32) -> (i32, i32) {
    %c0_i32 = arith.constant 0 : i32
    %c0_i32_0 = arith.constant 0 : i32
    return %arg0, %c0_i32 : i32, i32
  }
}

</mosaic_0001>

<bundles_post_ra>
// kernel: tpu_custom_call.1
= control target key start
LH: loop header
LB: loop body
LE: loop exit
PB: predicated region body
PF: predicated region fallthrough
CT: control target
= control target key end

     0   :  { %s3193_s0 = inlined_call_operand.hbm [shape: f32[16,8,48], index: 0, kind: input, shape index: {}]   ;;  %s3194_s1 = inlined_call_operand.hbm [shape: f32[16,16,32], index: 1, kind: input, shape index: {}]   ;;  %s3195_s2 = inlined_call_operand.hbm [shape: f32[48,128], index: 2, kind: input, shape index: {}]   ;;  %s3196_s3 = inlined_call_operand.vmem [shape: f32[1,128], index: 3, kind: input, shape index: {}]   ;;  %s3197_s4 = inlined_call_operand.hbm [shape: f32[32,128], index: 4, kind: input, shape index: {}]   ;;  %s3198_s5 = inlined_call_operand.vmem [shape: f32[1,128], index: 5, kind: input, shape index: {}]   ;;  %s3199_s6 = inlined_call_operand.hbm [shape: f32[16,32], index: 6, kind: output, shape index: {0}]   ;;  %s3200_s7 = inlined_call_operand.hbm [shape: f32[16,48], index: 7, kind: output, shape index: {1}]  }
   0x1   :  { %3209 = sst [smem:[#allocation21_spill]] %s3193_s0 }
   0x2   :  { %3210 = sst [smem:[#allocation22_spill]] %s3195_s2 }
   0x3   :  { %3211 = sst [smem:[#allocation23_spill]] %s3197_s4 }
   0x4   :  { %13 = vsyncpa [#allocation3], 0 }
   0x5   :  { %15 = vsyncpa [#allocation3 + $0x1], 0 }
   0x6   :  { %16 = vsyncpa [#allocation6], 0 }
   0x7   :  { %18 = vsyncpa [#allocation6 + $0x1], 0 }
   0x8   :  { %19 = vsyncpa [#allocation9], 0 }
   0x9   :  { %20 = vsyncpa [#allocation4], 0 }
   0xa   :  { %22 = vsyncpa [#allocation4 + $0x1], 0 }
   0xb   :  { %23 = vsyncpa [#allocation12], 0 }
   0xc   :  { %25 = vsyncpa [#allocation12 + $0x1], 0  ;;  %s2645_s24 = smov 0   ;;  %s2647_s25 = smov 0  }
   0xd   :  { %s2649_s26 = smov 0   ;;  %s2651_s27 = smov 0  }
   0xe LB: > { %3212 = sst [smem:[#allocation19_spill]] %s2589_s26  ;;  %s2666_s28 = sadd.s32 4294967295, %s2593_s27   ;;  %s2593_s27 = sphi %s2651_s27, %s3239_s27   ;;  %s2589_s26 = sphi %s2649_s26, %s3236_s26   ;;  %s2585_s25 = sphi %s2647_s25, %s3238_s25   ;;  %s2581_s24 = sphi %s2645_s24, %s3237_s24  }
   0xf   : > { %s1994_s29 = sadd.s32 4294967294, %s2593_s27   ;;  %p51_p0 = scmp.ne.s32.totalorder %s2585_s25, %s2581_s24 }
  0x10   : > { %p3205_p1 = scmp.eq.s32.totalorder %s2666_s28, 0  ;;  %p185_p2 = scmp.eq.s32.totalorder %s2666_s28, 1 }
  0x11   : > { %p191_p3 = scmp.eq.s32.totalorder %s1994_s29, 1  ;;  %p1995_p5 = scmp.ge.s32.totalorder %s2593_s27, 1 }
  0x12   : > { %p2675_p4 = por %p3205_p1, %p51_p0  ;;  %p224_p7 = scmp.lt.s32.totalorder %s2593_s27, 3 }
  0x13   : > { %p2680_p6 = por %p191_p3, %p51_p0  ;;  %s2595_s10 = smov [#allocation7]  }
  0x14   : > { %s3213_s30 = scalar_select %p2675_p4, 1, 0 }
  0x15   : > { %s3214_s8 = scalar_select %p2680_p6, 1, 0 }
  0x16   : > { %p2685_p8 = pnand %p1995_p5, %p224_p7  ;;  %s236_s11 = sshll.u32 %s2595_s10, 4  ;;  %s237_s11 = int_to_ptr.vmem [resolvable:$true] %s236_s11 }
  0x17   : > { %s2596_s13 = smov [#allocation8]   ;;  %s2390_s15 = scalar_lea.vmem %s237_s11, 768 }
  0x18   : > { %p2234_p9 = pneg %p2685_p8  ;;  %s252_s14 = sshll.u32 %s2596_s13, 4  ;;  %s253_s14 = int_to_ptr.vmem [resolvable:$true] %s252_s14 }
  0x19   : > { %p2391_p13 = scmp.ne.s32.totalorder %s237_s11, %s2390_s15  ;;  %p2398_p5 = scmp.lt.s32.totalorder %s237_s11, %s237_s11 }
  0x1a   : > { %p2694_p11 = pnand %p2234_p9, %p3205_p1  ;;  %p2399_p7 = scmp.lt.s32.totalorder %s2390_s15, %s2390_s15 }
  0x1c   : > { %p2381_p12 = pneg %p2694_p11  ;;  %p2400_p10 = por %p2399_p7, %p2398_p5 }
  0x1e   : > { %p2393_p0 = pnand %p2391_p13, %p2381_p12 }
  0x20   : > { %p2394_p3 = pneg %p2393_p0 }
  0x22   : > { %p2401_p9 = pnand %p2400_p10, %p2394_p3 }
  0x24   : > { %2404 = shalt.err (!%p2401_p9)
}
  0x25   : > { %s3201_s16 = smov 128   ;;  %s3203_s17 = smov 8  }
  0x26   : > { %s3217_s2 = sld [smem:[#allocation22_spill]]  ;;  %s2416_s20 = scalar_lea.vmem %s253_s14, 512 }
  0x27   : > { %p2417_p13 = scmp.ne.s32.totalorder %s253_s14, %s2416_s20  ;;  %p2424_p10 = scmp.lt.s32.totalorder %s253_s14, %s253_s14 }
  0x28   : > { %p2425_p3 = scmp.lt.s32.totalorder %s2416_s20, %s2416_s20 }
  0x29   : > { %p2419_p0 = pnand %p2417_p13, %p2381_p12 }
  0x2a   : > { %p2426_p7 = por %p2425_p3, %p2424_p10 }
  0x2b   : > { %p2420_p5 = pneg %p2419_p0 }
  0x2c   : > { %2237 = dma.hbm_to_vmem [thread:$0]  (!%p2694_p11), %s3217_s2, 768, %s237_s11, [#allocation6], %s3201_s16, %s3201_s16, %s3203_s17  }
  0x2d   : > { %p2427_p9 = pnand %p2426_p7, %p2420_p5 }
  0x2f   : > { %2430 = shalt.err (!%p2427_p9)
}
  0x30   : > { %s3218_s4 = sld [smem:[#allocation23_spill]]  ;;  %s2723_s23 = sadd.s32 1, %s2593_s27  }
  0x31   : > { %s38_s29 = sadd.s32 1, %s2589_s26  ;;  %s35_s10 = ssub.s32 %s2593_s27, %s2723_s23 }
  0x32   : > { %p45_p12 = scmp.ne.s32.totalorder %s2589_s26, %s2585_s25  ;;  %p36_p13 = scmp.eq.s32.totalorder %s35_s10, 0 }
  0x33   : > { %p46_p0 = scmp.eq.s32.totalorder %s2593_s27, 0  ;;  %p2257_p10 = scmp.lt.s32.totalorder %s2593_s27, 2 }
  0x34   : > { %p2733_p5 = por %p185_p2, %p45_p12  ;;  %s2742_s13 = sand.u32 1, %s2589_s26  }
  0x35   : > { %s2739_s12 = scalar_select %p36_p13, %s2589_s26, %s38_s29  }
  0x36   : > { %2240 = dma.hbm_to_vmem [thread:$0]  (!%p2694_p11), %s3218_s4, 512, %s253_s14, [#allocation9], %s3201_s16, %s3201_s16, %s3203_s17  }
  0x37   : > { %s3219_s11 = scalar_select %p2733_p5, 1, 0 }
  0x38   : > { %3220 = sst [smem:[#allocation20_spill]] %s2739_s12  ;;  %p47_p3 = por %p46_p0, %p45_p12 }
  0x39   : > { %s1999_s14 = sshll.u32 %s2742_s13, 6  ;;  %s2045_s15 = sshll.u32 %s2593_s27, 10 }
  0x3a   : > { %s3221_s0 = sld [smem:[#allocation21_spill]]  ;;  %s273_s21 = scalar_lea.vmem [#allocation2], %s1999_s14 }
  0x3b   : > { %s280_s22 = sshll.u32 %s273_s21, 4  ;;  %p2753_p2 = pnand %p2257_p10, %p47_p3  ;;  %s2751_s22 = int_to_ptr.vmem [resolvable:$true] %s280_s22 }
  0x3c   : > { %s270_s17 = scalar_lea.sflag [#allocation3], %s2742_s13 }
  0x3d   : > { %p2433_p7 = pneg %p2753_p2 }
  0x40   : > { %s2749_s20 = scalar_lea.hbm %s3221_s0, %s2045_s15  ;;  %s2436_s18 = scalar_lea.hbm %s3221_s0, 2048 }
  0x41   : > { %s2431_s2 = scalar_lea.hbm %s2749_s20, 1024  ;;  %p2437_p13 = scmp.lt.s32.totalorder %s2749_s20, %s3221_s0 }
  0x42   : > { %p2432_p11 = scmp.ne.s32.totalorder %s2749_s20, %s2431_s2  ;;  %p2438_p0 = scmp.lt.s32.totalorder %s2436_s18, %s2431_s2 }
  0x44   : > { %p2434_p9 = pnand %p2433_p7, %p2432_p11  ;;  %p2439_p10 = por %p2438_p0, %p2437_p13 }
  0x46   : > { %p2435_p12 = pneg %p2434_p9 }
  0x48   : > { %p2440_p3 = pnand %p2439_p10, %p2435_p12 }
  0x4a   : > { %2443 = shalt.err (!%p2440_p3)
}
  0x4b   : > { %s2444_s10 = scalar_lea.vmem %s2751_s22, 1024  ;;  %s2599_s14 = smov [#allocation2]  }
  0x4c   : > { %p2445_p1 = scmp.ne.s32.totalorder %s2751_s22, %s2444_s10  ;;  %s2449_s15 = sshll.u32 %s2599_s14, 4  ;;  %s2450_s15 = int_to_ptr.vmem [resolvable:$false] %s2449_s15 }
  0x4d   : > { %s2451_s16 = scalar_lea.vmem %s2450_s15, 2048  ;;  %p2452_p6 = scmp.lt.s32.totalorder %s2751_s22, %s2450_s15 }
  0x4e   : > { %p2447_p11 = pnand %p2445_p1, %p2433_p7  ;;  %p2453_p5 = scmp.lt.s32.totalorder %s2451_s16, %s2444_s10 }
  0x50   : > { %p2448_p9 = pneg %p2447_p11  ;;  %p2454_p4 = por %p2453_p5, %p2452_p6 }
  0x52   : > { %p2455_p13 = pnand %p2454_p4, %p2448_p9 }
  0x54   : > { %2458 = shalt.err (!%p2455_p13)
}
  0x55   : > { %s3223_s2 = smov 8   ;;  %s3224_s18 = smov 128  }
  0x56   : > { %2244 = dma.hbm_to_vmem [thread:$0]  (!%p2753_p2), %s2749_s20, 1024, %s2751_s22, %s270_s17, %s3224_s18, %s3224_s18, %s3223_s2  }
  0x57   : > { %s2047_s19 = sshll.u32 %s2593_s27, 11  ;;  %s3225_s14 = sshll.u32 %s2742_s13, 7 }
  0x58   : > { %s2793_s10 = scalar_lea.hbm %s3194_s1, %s2047_s19  ;;  %s294_s15 = scalar_lea.vmem [#allocation5], %s3225_s14 }
  0x59   : > { %s302_s0 = sshll.u32 %s294_s15, 4  ;;  %s3226_s4 = sand.u32 1, %s2593_s27   ;;  %s2797_s0 = int_to_ptr.vmem [resolvable:$true] %s302_s0 }
  0x5a   : > { %s291_s12 = scalar_lea.sflag [#allocation6], %s3226_s4  ;;  %s2459_s26 = scalar_lea.hbm %s2793_s10, 2048 }
  0x5b   : > { %p2460_p1 = scmp.ne.s32.totalorder %s2793_s10, %s2459_s26  ;;  %s2464_s22 = scalar_lea.hbm %s3194_s1, 4096 }
  0x5c   : > { %p2465_p5 = scmp.lt.s32.totalorder %s2793_s10, %s3194_s1  ;;  %p2466_p12 = scmp.lt.s32.totalorder %s2464_s22, %s2459_s26 }
  0x5d   : > { %p2462_p4 = pnand %p2460_p1, %p2433_p7 }
  0x5e   : > { %p2467_p0 = por %p2466_p12, %p2465_p5 }
  0x5f   : > { %p2463_p6 = pneg %p2462_p4 }
  0x61   : > { %p2468_p10 = pnand %p2467_p0, %p2463_p6 }
  0x63   : > { %2471 = shalt.err (!%p2468_p10)
}
  0x64   : > { %s2472_s4 = scalar_lea.vmem %s2797_s0, 2048  ;;  %s2600_s21 = smov [#allocation5]  }
  0x65   : > { %p2473_p3 = scmp.ne.s32.totalorder %s2797_s0, %s2472_s4  ;;  %s2477_s16 = sshll.u32 %s2600_s21, 4  ;;  %s2478_s16 = int_to_ptr.vmem [resolvable:$false] %s2477_s16 }
  0x66   : > { %s2479_s14 = scalar_lea.vmem %s2478_s16, 4096  ;;  %p2480_p13 = scmp.lt.s32.totalorder %s2797_s0, %s2478_s16 }
  0x67   : > { %p2475_p11 = pnand %p2473_p3, %p2433_p7  ;;  %p2481_p1 = scmp.lt.s32.totalorder %s2479_s14, %s2472_s4 }
  0x69   : > { %p2476_p9 = pneg %p2475_p11  ;;  %p2482_p4 = por %p2481_p1, %p2480_p13 }
  0x6b   : > { %p2483_p5 = pnand %p2482_p4, %p2476_p9 }
  0x6d   : > { %2486 = shalt.err (!%p2483_p5)
}
  0x6e   : > { %2247 = dma.hbm_to_vmem [thread:$0]  (!%p2753_p2), %s2793_s10, 2048, %s2797_s0, %s291_s12, %s3224_s18, %s3224_s18, %s3223_s2  }
  0x6f   : > { %314 = sbr.rel (%p2685_p8) target bundleno = 918 (0x396), region = 44  ;;  %s2829_s26 = sand.u32 (!%p2685_p8), 1, %s2585_s25  }
  0x70   : > { %s2007_s15 = sshll.u32 (!%p2685_p8), %s2829_s26, 6  ;;  %s317_s17 = scalar_lea.sflag (!%p2685_p8), [#allocation3], %s2829_s26 }
  0x71   : > { %s2833_s20 = scalar_lea.vmem (!%p2685_p8), [#allocation2], %s2007_s15  ;;  %p3227_p7 = scmp.ne.s32.totalorder (!%p2685_p8), %s3213_s30, 0 }
  0x74   : > { %2556 = dma.done.wait (%p3227_p7), %s317_s17, 1024  }
  0x75   : > { %2558 = vsyncadd (%p3227_p7), %s317_s17, 4294966272  ;;  %s325_s0 = sand.u32 1, %s2666_s28   ;;  %s2008_s9 = sshll.u32 %s2829_s26, 7 }
  0x76   : > { %s326_s12 = scalar_lea.sflag [#allocation6], %s325_s0  ;;  %s2841_s29 = scalar_lea.vmem [#allocation5], %s2008_s9 }
  0x77   : > { %2560 = dma.done.wait (%p3227_p7), %s326_s12, 2048  }
  0x78   : > { %2562 = vsyncadd (%p3227_p7), %s326_s12, 4294965248  ;;  %p3228_p8 = scmp.eq.s32.totalorder %s2666_s28, 0 }
  0x7a   : > { %2564 = dma.done.wait (%p3228_p8), [#allocation6], 768   ;;  %p3229_p2 = pmov %p3228_p8 }
  0x7c   : > { %2566 = vsyncadd (%p3229_p2), [#allocation6], 4294966528  ;;  %p3230_p6 = pmov %p3229_p2 }
  0x7d   : > { %p3231_p12 = pmov %p3229_p2 }
  0x7e   : > { %2568 = dma.done.wait (%p3230_p6), [#allocation9], 512  }
  0x7f   : > { %2570 = vsyncadd (%p3231_p12), [#allocation9], 4294966784  ;;  %v550_v0 = vld [vmem:[#allocation8 + $0x18] sm:$0xff]  ;;  %v549_v2 = vld [vmem:[#allocation8 + $0x10] sm:$0xff]  ;;  %vm558_vm0 = vcmask 261120   ;;  %vm417_vm1 = vcmask 392192  }
  0x80   : > { %v409_v1 = vld [vmem:[#allocation7 + $0x28] sm:$0xff]  ;;  %2130 = vmatprep.subr.mxu1 %v550_v0  ;;  %v408_v3 = vld [vmem:[#allocation7 + $0x20] sm:$0xff]  ;;  %v548_v4 = vld [vmem:[#allocation8 + $0x8] sm:$0xff]  ;;  %v2601_v34 = vmov 0.0   ;;  %vm2602_vm2 = vmmov 0   ;;  %vm1336_vm3 = vcmask 130048  }
  0x81   : > { %2106 = vmatprep.subr.mxu0 %v409_v1  ;;  %2131 = vmatpush3.msra.mxu1 %v550_v0  ;;  %v407_v5 = vld [vmem:[#allocation7 + $0x18] sm:$0xff]  ;;  %v547_v6 = vld [vmem:[#allocation8] sm:$0xff]  ;;  %v388_v8 = vld [vmem:[%s2841_s29] sm:$0xff]  ;;  %vm1689_vm4 = vcmask 1041409   ;;  %vm1691_vm5 = vcmask 1042434   ;;  %vm1693_vm6 = vcmask 1043459  }
  0x82   : > { %2107 = vmatpush3.msra.mxu0 %v409_v1  ;;  %2132 = vmatprep.subr.mxu1 %v549_v2  ;;  %v406_v7 = vld [vmem:[#allocation7 + $0x10] sm:$0xff]  ;;  %v389_v9 = vld [vmem:[%s2841_s29 + $0x8] sm:$0xff]  ;;  %v2860_v12 = vld [vmem:[%s2833_s20] sm:$0xff]  ;;  %vm1695_vm7 = vcmask 1044484   ;;  %vm1697_vm8 = vcmask 1045509   ;;  %s2011_s22 = sshll.u32 %s2829_s26, 3 }
  0x83   : > { %2108 = vmatprep.subr.mxu0 %v408_v3  ;;  %2133 = vmatpush3.msra.mxu1 %v549_v2  ;;  %v405_v10 = vld [vmem:[#allocation7 + $0x8] sm:$0xff]  ;;  %v390_v11 = vld [vmem:[%s2841_s29 + $0x10] sm:$0xff]  ;;  %v404_v13 = vld [vmem:[#allocation7] sm:$0xff]  ;;  %vm1699_vm9 = vcmask 1046534   ;;  %s2041_s13 = sshll.u32 %s2666_s28, 7  ;;  %vm1701_vm10 = vcmask 1047559  }
  0x84   : > { %2109 = vmatpush3.msra.mxu0 %v408_v3  ;;  %2134 = vmatprep.subr.mxu1 %v548_v4  ;;  %v391_v14 = vld [vmem:[%s2841_s29 + $0x18] sm:$0xff]  ;;  %v2868_v15 = vld [vmem:[%s2833_s20 + $0x8] sm:$0xff]  ;;  %v392_v16 = vld [vmem:[%s2841_s29 + $0x20] sm:$0xff]  ;;  %s377_s19 = scalar_lea.vmem [#allocation11], %s2011_s22  ;;  %s3088_s14 = scalar_lea.hbm %s3200_s7, %s2041_s13 }
  0x85   : > { %2110 = vmatprep.subr.mxu0 %v407_v5  ;;  %2135 = vmatpush3.msra.mxu1 %v548_v4  ;;  %v2872_v17 = vld [vmem:[%s2833_s20 + $0x10] sm:$0xff]  ;;  %v393_v18 = vld [vmem:[%s2841_s29 + $0x28] sm:$0xff]  ;;  %v2883_v20 = vld [vmem:[%s2833_s20 + $0x18] sm:$0xff]  ;;  %s1850_s4 = sshll.u32 %s377_s19, 4  ;;  %s1824_s15 = scalar_lea.sflag [#allocation12], %s2829_s26  ;;  %s1851_s4 = int_to_ptr.vmem [resolvable:$true] %s1850_s4 }
  0x86   : > { %2111 = vmatpush3.msra.mxu0 %v407_v5  ;;  %2136 = vmatprep.subr.mxu1 %v547_v6  ;;  %v394_v19 = vld [vmem:[%s2841_s29 + $0x30] sm:$0xff]  ;;  %v2886_v21 = vld [vmem:[%s2833_s20 + $0x20] sm:$0xff]  ;;  %v395_v22 = vld [vmem:[%s2841_s29 + $0x38] sm:$0xff]  ;;  %s2487_s17 = scalar_lea.vmem %s1851_s4, 128  ;;  %p3232_p10 = scmp.ne.s32.totalorder %s3219_s11, 0 }
  0x87   : > { %2112 = vmatprep.subr.mxu0 %v406_v7  ;;  %2137 = vmatpush3.msra.mxu1 %v547_v6  ;;  %v396_v23 = vld [vmem:[%s2841_s29 + $0x40] sm:$0xff]  ;;  %v2897_v24 = vld [vmem:[%s2833_s20 + $0x28] sm:$0xff]  ;;  %v2900_v25 = vld [vmem:[%s2833_s20 + $0x30] sm:$0xff]  ;;  %p2488_p0 = scmp.ne.s32.totalorder %s1851_s4, %s2487_s17 }
  0x88   : > { %2138 = vmatprep.mubr.msk.f32.mxu1 %vm558_vm0, %v388_v8  ;;  %2113 = vmatpush3.msra.mxu0 %v406_v7  ;;  %v397_v26 = vld [vmem:[%s2841_s29 + $0x48] sm:$0xff]  ;;  %v398_v27 = vld [vmem:[%s2841_s29 + $0x50] sm:$0xff]  ;;  %v2911_v28 = vld [vmem:[%s2833_s20 + $0x38] sm:$0xff]  ;;  %s2603_s20 = smov [#allocation11]  }
  0x89   : > { %2139 = vmatmul.mubr.msk.f32.vlgmr.msra.gmra.mxu1 %vm558_vm0, %v389_v9  ;;  %2114 = vmatprep.subr.mxu0 %v405_v10  ;;  %v399_v29 = vld [vmem:[%s2841_s29 + $0x58] sm:$0xff]  ;;  %v400_v30 = vld [vmem:[%s2841_s29 + $0x60] sm:$0xff]  ;;  %v401_v31 = vld [vmem:[%s2841_s29 + $0x68] sm:$0xff]  ;;  %p2489_p3 = pnand %p2488_p0, %p3232_p10  ;;  %s2491_s0 = sshll.u32 %s2603_s20, 4  ;;  %s2492_s0 = int_to_ptr.vmem [resolvable:$false] %s2491_s0 }
  0x8a   : > { %2141 = vmatprep.mubr.msk.f32.mxu1 %vm558_vm0, %v390_v11  ;;  %2115 = vmatpush3.msra.mxu0 %v405_v10  ;;  %v402_v32 = vld [vmem:[%s2841_s29 + $0x70] sm:$0xff]  ;;  %v403_v33 = vld [vmem:[%s2841_s29 + $0x78] sm:$0xff]  ;;  %v2936_v35 = vld [vmem:[%s3198_s5] ss:$0 sm:$0xff]  ;;  %s2493_s9 = scalar_lea.vmem %s2492_s0, 256  ;;  %p2494_p9 = scmp.lt.s32.totalorder %s1851_s4, %s2492_s0 }
  0x8b   : > { %2118 = vmatprep.mubr.msk.f32.mxu0 %vm417_vm1, %v2860_v12  ;;  %2116 = vmatprep.subr.mxu0 %v404_v13  ;;  %v2944_v42 = vld [vmem:[%s3196_s3] ss:$0 sm:$0xff]  ;;  %p2490_p11 = pneg %p2489_p3  ;;  %p2495_p13 = scmp.lt.s32.totalorder %s2493_s9, %s2487_s17 }
  0x8c   : > { %2117 = vmatpush3.msra.mxu0 %v404_v13  ;;  %2176 = vmatprep.subr.mxu1 %v2601_v34 }
  0x8d   : > { %2142 = vmatmul.mubr.msk.f32.gmra.mxu1 %vm558_vm0, %v391_v14  ;;  %2119 = vmatmul.mubr.msk.f32.vlgmr.msra.gmra.mxu0 %vm417_vm1, %v2868_v15  ;;  %p2496_p1 = por %p2495_p13, %p2494_p9 }
  0x8e   : > { %2144 = vmatprep.mubr.msk.f32.mxu1 %vm558_vm0, %v392_v16  ;;  %2121 = vmatprep.mubr.msk.f32.mxu0 %vm417_vm1, %v2872_v17 }
  0x8f   : > { %2162 = vmatprep.subr.mxu0 %v2601_v34  ;;  %p2497_p4 = pnand %p2496_p1, %p2490_p11 }
  0x91   : > { %2145 = vmatmul.mubr.msk.f32.gmra.mxu1 %vm558_vm0, %v393_v18  ;;  %2122 = vmatmul.mubr.msk.f32.gmra.mxu0 %vm417_vm1, %v2883_v20 }
  0x92   : > { %2147 = vmatprep.mubr.msk.f32.mxu1 %vm558_vm0, %v394_v19  ;;  %2124 = vmatprep.mubr.msk.f32.mxu0 %vm417_vm1, %v2886_v21 }
  0x95   : > { %2148 = vmatmul.mubr.msk.f32.gmra.mxu1 %vm558_vm0, %v395_v22  ;;  %2125 = vmatmul.mubr.msk.f32.gmra.mxu0 %vm417_vm1, %v2897_v24 }
  0x96   : > { %2150 = vmatprep.mubr.msk.f32.mxu1 %vm558_vm0, %v396_v23  ;;  %2127 = vmatprep.mubr.msk.f32.mxu0 %vm417_vm1, %v2900_v25 }
  0x99   : > { %2151 = vmatmul.mubr.msk.f32.gmra.mxu1 %vm558_vm0, %v397_v26  ;;  %2128 = vmatmul.mubr.msk.f32.gmra.mxu0 %vm417_vm1, %v2911_v28 }
  0x9a   : > { %2153 = vmatprep.mubr.msk.f32.mxu1 %vm558_vm0, %v398_v27  ;;  %2166 = vmatprep.mubr.msk.f32.mxu0 %vm2602_vm2, %v2601_v34 }
  0x9d   : > { %2154 = vmatmul.mubr.msk.f32.gmra.mxu1 %vm558_vm0, %v399_v29 }
  0x9e   : > { %2156 = vmatprep.mubr.msk.f32.mxu1 %vm558_vm0, %v400_v30 }
  0xa1   : > { %2157 = vmatmul.mubr.msk.f32.gmra.mxu1 %vm558_vm0, %v401_v31 }
  0xa2   : > { %2159 = vmatprep.mubr.msk.f32.mxu1 %vm558_vm0, %v402_v32 }
  0xa5   : > { %2160 = vmatmul.mubr.msk.f32.gmra.mxu1 %vm558_vm0, %v403_v33 }
  0xa6   : > { %2180 = vmatprep.mubr.msk.f32.mxu1 %vm2602_vm2, %v2601_v34 }
 0x149   : > { %v2140_v36 = vpop.f32.mrf.mxu1 }
 0x14a   : > { %v679_v37 = vadd.f32 %v2140_v36, %v2936_v35 }
 0x14b   : > { %v673_v38 = vpop.f32.mrf.mxu1 }
 0x14c   : > { %2163 = vmatpush3.xpose.msra.mxu0 %v679_v37  ;;  %v674_v40 = vadd.f32 %v2936_v35, %v673_v38 }
 0x14d   : > { %v2143_v39 = vpop.f32.mrf.mxu1  ;;  %2164 = vmatprep.subr.mxu0 %v2601_v34  ;;  %v2120_v41 = vpop.f32.mrf.mxu0 }
 0x14e   : > { %v689_v44 = vadd.f32 %v2143_v39, %v2936_v35  ;;  %v514_v59 = vadd.f32 %v2120_v41, %v2944_v42 }
 0x14f   : > { %v683_v43 = vpop.f32.mrf.mxu1  ;;  %v508_v45 = vpop.f32.mrf.mxu0 }
 0x150   : > { %2165 = vmatpush3.xpose.msra.mxu0 %v674_v40  ;;  %v509_v46 = vadd.f32 %v2944_v42, %v508_v45  ;;  %v684_v54 = vadd.f32 %v2936_v35, %v683_v43 }
 0x151   : > { %v2146_v47 = vpop.f32.mrf.mxu1  ;;  %2169 = vmatprep.subr.mxu0 %v2601_v34  ;;  %v2123_v49 = vpop.f32.mrf.mxu0 }
 0x152   : > { %v699_v48 = vadd.f32 %v2146_v47, %v2936_v35  ;;  %v524_v7 = vadd.f32 %v2123_v49, %v2944_v42 }
 0x153   : > { %v693_v50 = vpop.f32.mrf.mxu1  ;;  %2167 = vmatmul.mubr.f32.vlgmr.msra.gmra.mxu0 %v509_v46  ;;  %v518_v52 = vpop.f32.mrf.mxu0 }
 0x154   : > { %v694_v51 = vadd.f32 %v2936_v35, %v693_v50  ;;  %2170 = vmatpush3.xpose.msra.mxu0 %v689_v44  ;;  %2177 = vmatpush3.xpose.msra.mxu1 %v699_v48  ;;  %v519_v56 = vadd.f32 %v2944_v42, %v518_v52 }
 0x155   : > { %v2149_v53 = vpop.f32.mrf.mxu1  ;;  %2171 = vmatprep.subr.mxu0 %v2601_v34  ;;  %2178 = vmatprep.subr.mxu1 %v2601_v34  ;;  %v2126_v58 = vpop.f32.mrf.mxu0 }
 0x156   : > { %2173 = vmatprep.mubr.msk.f32.mxu0 %vm2602_vm2, %v2601_v34  ;;  %v709_v57 = vadd.f32 %v2149_v53, %v2936_v35  ;;  %v534_v22 = vadd.f32 %v2126_v58, %v2944_v42 }
 0x157   : > { %v703_v55 = vpop.f32.mrf.mxu1  ;;  %v528_v1 = vpop.f32.mrf.mxu0 }
 0x158   : > { %2172 = vmatpush3.xpose.msra.mxu0 %v684_v54  ;;  %2179 = vmatpush3.xpose.msra.mxu1 %v694_v51  ;;  %v704_v63 = vadd.f32 %v2936_v35, %v703_v55  ;;  %v529_v4 = vadd.f32 %v2944_v42, %v528_v1 }
 0x159   : > { %v2152_v60 = vpop.f32.mrf.mxu1  ;;  %2183 = vmatprep.subr.mxu0 %v2601_v34  ;;  %2190 = vmatprep.subr.mxu1 %v2601_v34  ;;  %v2129_v6 = vpop.f32.mrf.mxu0 }
 0x15a   : > { %v719_v61 = vadd.f32 %v2152_v60, %v2936_v35  ;;  %v544_v27 = vadd.f32 %v2129_v6, %v2944_v42 }
 0x15b   : > { %v713_v62 = vpop.f32.mrf.mxu1  ;;  %2174 = vmatmul.mubr.f32.vlgmr.msra.gmra.mxu0 %v514_v59  ;;  %2181 = vmatmul.mubr.f32.vlgmr.msra.gmra.mxu1 %v519_v56  ;;  %v538_v14 = vpop.f32.mrf.mxu0 }
 0x15c   : > { %v714_v0 = vadd.f32 %v2936_v35, %v713_v62  ;;  %2184 = vmatpush3.xpose.msra.mxu0 %v709_v57  ;;  %2191 = vmatpush3.xpose.msra.mxu1 %v719_v61  ;;  %v539_v18 = vadd.f32 %v2944_v42, %v538_v14 }
 0x15d   : > { %v2155_v2 = vpop.f32.mrf.mxu1  ;;  %2185 = vmatprep.subr.mxu0 %v2601_v34  ;;  %2192 = vmatprep.subr.mxu1 %v2601_v34 }
 0x15e   : > { %2187 = vmatprep.mubr.msk.f32.mxu0 %vm2602_vm2, %v2601_v34  ;;  %2194 = vmatprep.mubr.msk.f32.mxu1 %vm2602_vm2, %v2601_v34  ;;  %v729_v5 = vadd.f32 %v2155_v2, %v2936_v35 }
 0x15f   : > { %v723_v3 = vpop.f32.mrf.mxu1 }
 0x160   : > { %2186 = vmatpush3.xpose.msra.mxu0 %v704_v63  ;;  %2193 = vmatpush3.xpose.msra.mxu1 %v714_v0  ;;  %v724_v11 = vadd.f32 %v2936_v35, %v723_v3 }
 0x161   : > { %v2158_v8 = vpop.f32.mrf.mxu1  ;;  %2197 = vmatprep.subr.mxu0 %v2601_v34  ;;  %2204 = vmatprep.subr.mxu1 %v2601_v34 }
 0x162   : > { %v739_v9 = vadd.f32 %v2158_v8, %v2936_v35 }
 0x163   : > { %2188 = vmatmul.mubr.f32.vlgmr.msra.gmra.mxu0 %v524_v7  ;;  %2195 = vmatmul.mubr.f32.vlgmr.msra.gmra.mxu1 %v529_v4  ;;  %v733_v10 = vpop.f32.mrf.mxu1 }
 0x164   : > { %2198 = vmatpush3.xpose.msra.mxu0 %v729_v5  ;;  %2205 = vmatpush3.xpose.msra.mxu1 %v739_v9  ;;  %v734_v13 = vadd.f32 %v2936_v35, %v733_v10 }
 0x165   : > { %2199 = vmatprep.subr.mxu0 %v2601_v34  ;;  %2206 = vmatprep.subr.mxu1 %v2601_v34  ;;  %v2161_v16 = vpop.f32.mrf.mxu1 }
 0x166   : > { %2201 = vmatprep.mubr.msk.f32.mxu0 %vm2602_vm2, %v2601_v34  ;;  %2208 = vmatprep.mubr.msk.f32.mxu1 %vm2602_vm2, %v2601_v34  ;;  %v749_v19 = vadd.f32 %v2161_v16, %v2936_v35 }
 0x167   : > { %v743_v23 = vpop.f32.mrf.mxu1 }
 0x168   : > { %2200 = vmatpush3.xpose.msra.mxu0 %v724_v11  ;;  %2207 = vmatpush3.xpose.msra.mxu1 %v734_v13  ;;  %v744_v26 = vadd.f32 %v2936_v35, %v743_v23 }
 0x169   : > { %2211 = vmatprep.subr.mxu0 %v2601_v34 }
 0x16b   : > { %2202 = vmatmul.mubr.f32.vlgmr.msra.gmra.mxu0 %v534_v22  ;;  %2209 = vmatmul.mubr.f32.vlgmr.msra.gmra.mxu1 %v539_v18 }
 0x16c   : > { %2212 = vmatpush3.xpose.msra.mxu0 %v749_v19  ;;  %2215 = vmatprep.mubr.msk.f32.mxu0 %vm2602_vm2, %v2601_v34 }
 0x16d   : > { %2213 = vmatprep.subr.mxu0 %v2601_v34 }
 0x170   : > { %2214 = vmatpush3.xpose.msra.mxu0 %v744_v26 }
 0x173   : > { %2216 = vmatmul.mubr.f32.vlgmr.msra.gmra.mxu0 %v544_v27 }
 0x213   : > { %v818_v29 = vpop.f32.mrf.mxu0 }
 0x214   : > { %2299 = vtanh.f32 %v818_v29 }
 0x215   : > { %v2168_v30 = vpop.f32.mrf.mxu0 }
 0x21b   : > { %v888_v31 = vpop.f32.mrf.mxu0  ;;  %v958_v32 = vpop.f32.mrf.mxu1 }
 0x21c   : > { %2301 = vtanh.f32 %v888_v31 }
 0x21d   : > { %2303 = vtanh.f32 %v958_v32  ;;  %v2175_v33 = vpop.f32.mrf.mxu0  ;;  %v2182_v36 = vpop.f32.mrf.mxu1 }
 0x221   : > { %v2300_v37 = vpop.eup %2299 }
 0x222   : > { %v1320_v35 = vmul.f32 1.442695, %v2300_v37 }
 0x223   : > { %v1028_v38 = vpop.f32.mrf.mxu0  ;;  %v1098_v39 = vpop.f32.mrf.mxu1 }
 0x224   : > { %2305 = vpow2.f32 %v1320_v35 }
 0x225   : > { %2307 = vtanh.f32 %v1028_v38  ;;  %v2189_v34 = vpop.f32.mrf.mxu0  ;;  %v2196_v40 = vpop.f32.mrf.mxu1 }
 0x226   : > { %2309 = vtanh.f32 %v1098_v39 }
 0x229   : > { %v2302_v41 = vpop.eup %2301 }
 0x22a   : > { %v2304_v42 = vpop.eup %2303  ;;  %v1322_v43 = vmul.f32 1.442695, %v2302_v41 }
 0x22b   : > { %v1324_v44 = vmul.f32 1.442695, %v2304_v42  ;;  %v1168_v45 = vpop.f32.mrf.mxu0  ;;  %v1238_v46 = vpop.f32.mrf.mxu1 }
 0x22c   : > { %2311 = vpow2.f32 %v1322_v43 }
 0x22d   : > { %2313 = vpow2.f32 %v1324_v44  ;;  %v2203_v47 = vpop.f32.mrf.mxu0  ;;  %v2210_v48 = vpop.f32.mrf.mxu1 }
 0x22e   : > { %2315 = vtanh.f32 %v1168_v45 }
 0x22f   : > { %2317 = vtanh.f32 %v1238_v46 }
 0x231   : > { %v2993_v49 = vpop.eup %2305 }
 0x232   : > { %v2308_v50 = vpop.eup %2307  ;;  %v1337_v51 = vsel %vm1336_vm3, %v2993_v49, 0.0 }
 0x233   : > { %v2310_v52 = vpop.eup %2309  ;;  %v1326_v53 = vmul.f32 1.442695, %v2308_v50  ;;  %1338 = vadd.xlane.f32.xlu0 %v1337_v51  ;;  %v1393_v54 = vrot.slane %v1337_v51, 4  ;;  %v1308_v55 = vpop.f32.mrf.mxu0 }
 0x234   : > { %v1328_v56 = vmul.f32 1.442695, %v2310_v52  ;;  %2319 = vtanh.f32 %v1308_v55 }
 0x235   : > { %2321 = vpow2.f32 %v1326_v53  ;;  %v1394_v57 = vadd.f32 %v1393_v54, %v1337_v51  ;;  %v2217_v58 = vpop.f32.mrf.mxu0 }
 0x236   : > { %2323 = vpow2.f32 %v1328_v56 }
 0x237   : > { %v1395_v59 = vrot.slane %v1394_v57, 2 }
 0x239   : > { %v2997_v60 = vpop.eup %2311  ;;  %v1396_v61 = vadd.f32 %v1395_v59, %v1394_v57 }
 0x23a   : > { %v2999_v62 = vpop.eup %2313  ;;  %v1340_v63 = vsel %vm1336_vm3, %v2997_v60, 0.0 }
 0x23b   : > { %v2316_v0 = vpop.eup %2315  ;;  %v1397_v1 = vrot.slane %v1396_v61, 1  ;;  %v1343_v2 = vsel %vm1336_vm3, %v2999_v62, 0.0  ;;  %1341 = vadd.xlane.f32.xlu0 %v1340_v63  ;;  %v1399_v3 = vrot.slane %v1340_v63, 4 }
 0x23c   : > { %v2318_v4 = vpop.eup %2317  ;;  %v1330_v5 = vmul.f32 1.442695, %v2316_v0  ;;  %1344 = vadd.xlane.f32.xlu1 %v1343_v2  ;;  %v1405_v6 = vrot.slane %v1343_v2, 4 }
 0x23d   : > { %v1332_v7 = vmul.f32 1.442695, %v2318_v4  ;;  %v1398_v8 = vadd.f32 %v1397_v1, %v1396_v61  ;;  %v1400_v9 = vadd.f32 %v1399_v3, %v1340_v63 }
 0x23e   : > { %2325 = vpow2.f32 %v1330_v5  ;;  %v1406_v10 = vadd.f32 %v1405_v6, %v1343_v2 }
 0x23f   : > { %2327 = vpow2.f32 %v1332_v7  ;;  %v1401_v11 = vrot.slane %v1400_v9, 2 }
 0x240   : > { %2329 = vrcp.f32 %v1398_v8  ;;  %v1407_v13 = vrot.slane %v1406_v10, 2 }
 0x241   : > { %v2320_v14 = vpop.eup %2319  ;;  %v1402_v16 = vadd.f32 %v1401_v11, %v1400_v9 }
 0x242   : > { %v3005_v18 = vpop.eup %2321  ;;  %v1334_v19 = vmul.f32 1.442695, %v2320_v14  ;;  %v1408_v22 = vadd.f32 %v1407_v13, %v1406_v10 }
 0x243   : > { %v3007_v23 = vpop.eup %2323  ;;  %v1403_v26 = vrot.slane %v1402_v16, 1  ;;  %v1346_v27 = vsel %vm1336_vm3, %v3005_v18, 0.0 }
 0x244   : > { %2331 = vpow2.f32 %v1334_v19  ;;  %v1409_v29 = vrot.slane %v1408_v22, 1  ;;  %v1349_v30 = vsel %vm1336_vm3, %v3007_v23, 0.0  ;;  %1347 = vadd.xlane.f32.xlu1 %v1346_v27  ;;  %v1411_v31 = vrot.slane %v1346_v27, 4 }
 0x245   : > { %v1404_v32 = vadd.f32 %v1403_v26, %v1402_v16  ;;  %v1417_v33 = vrot.slane %v1349_v30, 4  ;;  %1350 = vadd.xlane.f32.xlu0 %v1349_v30 }
 0x246   : > { %v1410_v36 = vadd.f32 %v1409_v29, %v1408_v22  ;;  %v1412_v37 = vadd.f32 %v1411_v31, %v1346_v27 }
 0x247   : > { %2333 = vrcp.f32 %v1404_v32  ;;  %v1418_v35 = vadd.f32 %v1417_v33, %v1349_v30 }
 0x248   : > { %2335 = vrcp.f32 %v1410_v36  ;;  %v1413_v38 = vrot.slane %v1412_v37, 2 }
 0x249   : > { %v1419_v39 = vrot.slane %v1418_v35, 2 }
 0x24a   : > { %v1414_v34 = vadd.f32 %v1413_v38, %v1412_v37 }
 0x24b   : > { %v3013_v40 = vpop.eup %2325  ;;  %v1420_v41 = vadd.f32 %v1419_v39, %v1418_v35 }
 0x24c   : > { %v3015_v42 = vpop.eup %2327  ;;  %v1415_v43 = vrot.slane %v1414_v34, 1  ;;  %v1352_v44 = vsel %vm1336_vm3, %v3013_v40, 0.0 }
 0x24d   : > { %v2330_v45 = vpop.eup %2329  ;;  %v1421_v46 = vrot.slane %v1420_v41, 1  ;;  %v1355_v47 = vsel %vm1336_vm3, %v3015_v42, 0.0  ;;  %1353 = vadd.xlane.f32.xlu1 %v1352_v44  ;;  %v1423_v48 = vrot.slane %v1352_v44, 4 }
 0x24e   : > { %v1416_v50 = vadd.f32 %v1415_v43, %v1414_v34  ;;  %v1429_v51 = vrot.slane %v1355_v47, 4  ;;  %1356 = vadd.xlane.f32.xlu0 %v1355_v47  ;;  %v1449_v52 = vmul.f32 %v2330_v45, %v1398_v8 }
 0x24f   : > { %v1422_v53 = vadd.f32 %v1421_v46, %v1420_v41  ;;  %v1424_v54 = vadd.f32 %v1423_v48, %v1352_v44 }
 0x250   : > { %2337 = vrcp.f32 %v1416_v50  ;;  %v1430_v55 = vadd.f32 %v1429_v51, %v1355_v47  ;;  %v1457_v56 = vsub.f32 2.0, %v1449_v52 }
 0x251   : > { %v3021_v57 = vpop.eup %2331  ;;  %2339 = vrcp.f32 %v1422_v53  ;;  %v1425_v58 = vrot.slane %v1424_v54, 2 }
 0x252   : > { %v1431_v59 = vrot.slane %v1430_v55, 2  ;;  %v1358_v61 = vsel %vm1336_vm3, %v3021_v57, 0.0  ;;  %v1465_v63 = vmul.f32 %v2330_v45, %v1457_v56 }
 0x253   : > { %v1426_v0 = vadd.f32 %v1425_v58, %v1424_v54  ;;  %1359 = vadd.xlane.f32.xlu1 %v1358_v61  ;;  %v1435_v1 = vrot.slane %v1358_v61, 4 }
 0x254   : > { %v2334_v2 = vpop.eup %2333  ;;  %v1432_v3 = vadd.f32 %v1431_v59, %v1430_v55  ;;  %v1705_v4 = vmul.f32 %v2993_v49, %v1465_v63 }
 0x255   : > { %v2336_v5 = vpop.eup %2335  ;;  %v1427_v6 = vrot.slane %v1426_v0, 1  ;;  %v1436_v7 = vadd.f32 %v1435_v1, %v1358_v61  ;;  %v1450_v8 = vmul.f32 %v2334_v2, %v1404_v32 }
 0x256   : > { %v1433_v9 = vrot.slane %v1432_v3, 1  ;;  %v1713_v10 = vsel %vm1336_vm3, %v1705_v4, 0.0  ;;  %v1451_v11 = vmul.f32 %v2336_v5, %v1410_v36 }
 0x257   : > { %v1428_v13 = vadd.f32 %v1427_v6, %v1426_v0  ;;  %v1437_v14 = vrot.slane %v1436_v7, 2  ;;  %1714 = vadd.xlane.f32.xlu0 %v1713_v10  ;;  %v1458_v16 = vsub.f32 2.0, %v1450_v8 }
 0x258   : > { %v1434_v19 = vadd.f32 %v1433_v9, %v1432_v3  ;;  %v1459_v22 = vsub.f32 2.0, %v1451_v11 }
 0x259   : > { %2341 = vrcp.f32 %v1428_v13  ;;  %v1438_v26 = vadd.f32 %v1437_v14, %v1436_v7  ;;  %v1466_v27 = vmul.f32 %v2334_v2, %v1458_v16 }
 0x25a   : > { %2343 = vrcp.f32 %v1434_v19  ;;  %v1467_v29 = vmul.f32 %v2336_v5, %v1459_v22 }
 0x25b   : > { %v1439_v30 = vrot.slane %v1438_v26, 1  ;;  %v1706_v31 = vmul.f32 %v2997_v60, %v1466_v27 }
 0x25c   : > { %v1707_v32 = vmul.f32 %v2999_v62, %v1467_v29 }
 0x25d   : > { %v2338_v33 = vpop.eup %2337  ;;  %v1440_v37 = vadd.f32 %v1439_v30, %v1438_v26  ;;  %v1716_v36 = vsel %vm1336_vm3, %v1706_v31, 0.0 }
 0x25e   : > { %v2340_v35 = vpop.eup %2339  ;;  %v1719_v38 = vsel %vm1336_vm3, %v1707_v32, 0.0  ;;  %1717 = vadd.xlane.f32.xlu1 %v1716_v36  ;;  %v1452_v39 = vmul.f32 %v2338_v33, %v1416_v50 }
 0x25f   : > { %2345 = vrcp.f32 %v1440_v37  ;;  %1720 = vadd.xlane.f32.xlu0 %v1719_v38  ;;  %v1453_v34 = vmul.f32 %v2340_v35, %v1422_v53 }
 0x260   : > { %v1460_v41 = vsub.f32 2.0, %v1452_v39 }
 0x261   : > { %v1461_v43 = vsub.f32 2.0, %v1453_v34 }
 0x262   : > { %v1468_v44 = vmul.f32 %v2338_v33, %v1460_v41 }
 0x263   : > { %v1469_v45 = vmul.f32 %v2340_v35, %v1461_v43 }
 0x264   : > { %v1708_v46 = vmul.f32 %v3005_v18, %v1468_v44 }
 0x265   : > { %v1709_v47 = vmul.f32 %v3007_v23, %v1469_v45 }
 0x266   : > { %v2342_v48 = vpop.eup %2341  ;;  %v1722_v51 = vsel %vm1336_vm3, %v1708_v46, 0.0 }
 0x267   : > { %v2344_v52 = vpop.eup %2343  ;;  %v1725_v54 = vsel %vm1336_vm3, %v1709_v47, 0.0  ;;  %1723 = vadd.xlane.f32.xlu1 %v1722_v51  ;;  %v1454_v55 = vmul.f32 %v2342_v48, %v1428_v13 }
 0x268   : > { %1726 = vadd.xlane.f32.xlu0 %v1725_v54  ;;  %v1455_v50 = vmul.f32 %v2344_v52, %v1434_v19 }
 0x269   : > { %v1462_v56 = vsub.f32 2.0, %v1454_v55 }
 0x26a   : > { %v1463_v53 = vsub.f32 2.0, %v1455_v50 }
 0x26b   : > { %v1470_v58 = vmul.f32 %v2342_v48, %v1462_v56 }
 0x26c   : > { %v2346_v59 = vpop.eup %2345  ;;  %v1471_v61 = vmul.f32 %v2344_v52, %v1463_v53 }
 0x26d   : > { %v1710_v63 = vmul.f32 %v3013_v40, %v1470_v58  ;;  %v1456_v0 = vmul.f32 %v2346_v59, %v1440_v37 }
 0x26e   : > { %v1711_v1 = vmul.f32 %v3015_v42, %v1471_v61 }
 0x26f   : > { %v1728_v2 = vsel %vm1336_vm3, %v1710_v63, 0.0  ;;  %v1464_v3 = vsub.f32 2.0, %v1456_v0 }
 0x270   : > { %v1731_v4 = vsel %vm1336_vm3, %v1711_v1, 0.0  ;;  %1729 = vadd.xlane.f32.xlu1 %v1728_v2 }
 0x271   : > { %1732 = vadd.xlane.f32.xlu0 %v1731_v4  ;;  %v1472_v5 = vmul.f32 %v2346_v59, %v1464_v3 }
 0x273   : > { %v1712_v6 = vmul.f32 %v3021_v57, %v1472_v5 }
 0x275   : > { %v1734_v7 = vsel %vm1336_vm3, %v1712_v6, 0.0 }
 0x276   : > { %1735 = vadd.xlane.f32.xlu1 %v1734_v7 }
 0x2bc   : > { %v1339_v8 = vpop.xlane.xlu0 %1338 }
 0x2bd   : > { %2347 = vrcp.f32 %v1339_v8 }
 0x2c4   : > { %v1342_v9 = vpop.xlane.xlu0 %1341 }
 0x2c5   : > { %v1345_v10 = vpop.xlane.xlu1 %1344  ;;  %2349 = vrcp.f32 %v1342_v9 }
 0x2c6   : > { %2351 = vrcp.f32 %v1345_v10 }
 0x2ca   : > { %v2348_v11 = vpop.eup %2347 }
 0x2cb   : > { %v1369_v13 = vmul.f32 %v2348_v11, %v1339_v8 }
 0x2cd   : > { %v1377_v14 = vsub.f32 2.0, %v1369_v13  ;;  %v1348_v16 = vpop.xlane.xlu1 %1347 }
 0x2ce   : > { %v1351_v19 = vpop.xlane.xlu0 %1350  ;;  %2353 = vrcp.f32 %v1348_v16 }
 0x2cf   : > { %v1385_v22 = vmul.f32 %v2348_v11, %v1377_v14  ;;  %2355 = vrcp.f32 %v1351_v19 }
 0x2d1   : > { %v1473_v26 = vmul.f32 %v2993_v49, %v1385_v22 }
 0x2d2   : > { %v2350_v27 = vpop.eup %2349 }
 0x2d3   : > { %v2352_v29 = vpop.eup %2351  ;;  %v1370_v30 = vmul.f32 %v2350_v27, %v1342_v9  ;;  %v1481_v31 = vsel %vm1336_vm3, %v1473_v26, 0.0 }
 0x2d4   : > { %v1371_v32 = vmul.f32 %v2352_v29, %v1345_v10  ;;  %v1482_v33 = vrot.slane %v1481_v31, 4 }
 0x2d5   : > { %v1378_v37 = vsub.f32 2.0, %v1370_v30 }
 0x2d6   : > { %v1379_v36 = vsub.f32 2.0, %v1371_v32  ;;  %v1354_v35 = vpop.xlane.xlu1 %1353  ;;  %v1483_v38 = vadd.f32 %v1482_v33, %v1481_v31 }
 0x2d7   : > { %v1386_v39 = vmul.f32 %v2350_v27, %v1378_v37  ;;  %v1357_v34 = vpop.xlane.xlu0 %1356  ;;  %2357 = vrcp.f32 %v1354_v35 }
 0x2d8   : > { %v1387_v41 = vmul.f32 %v2352_v29, %v1379_v36  ;;  %2359 = vrcp.f32 %v1357_v34  ;;  %v1484_v43 = vrot.slane %v1483_v38, 2 }
 0x2d9   : > { %v1474_v44 = vmul.f32 %v2997_v60, %v1386_v39 }
 0x2da   : > { %v1475_v49 = vmul.f32 %v2999_v62, %v1387_v41  ;;  %v1485_v45 = vadd.f32 %v1484_v43, %v1483_v38 }
 0x2db   : > { %v2354_v46 = vpop.eup %2353  ;;  %v1488_v47 = vsel %vm1336_vm3, %v1474_v44, 0.0 }
 0x2dc   : > { %v2356_v48 = vpop.eup %2355  ;;  %v1372_v51 = vmul.f32 %v2354_v46, %v1348_v16  ;;  %v1360_v52 = vpop.xlane.xlu1 %1359  ;;  %v1486_v54 = vrot.slane %v1485_v45, 1  ;;  %v1495_v55 = vsel %vm1336_vm3, %v1475_v49, 0.0  ;;  %v1489_v50 = vrot.slane %v1488_v47, 4 }
 0x2dd   : > { %v1373_v56 = vmul.f32 %v2356_v48, %v1351_v19  ;;  %2361 = vrcp.f32 %v1360_v52  ;;  %v1496_v53 = vrot.slane %v1495_v55, 4 }
 0x2de   : > { %v1380_v58 = vsub.f32 2.0, %v1372_v51  ;;  %v1487_v59 = vadd.f32 %v1486_v54, %v1485_v45  ;;  %v1490_v61 = vadd.f32 %v1489_v50, %v1488_v47 }
 0x2df   : > { %v1381_v60 = vsub.f32 2.0, %v1373_v56  ;;  %v1497_v63 = vadd.f32 %v1496_v53, %v1495_v55 }
 0x2e0   : > { %v1388_v62 = vmul.f32 %v2354_v46, %v1380_v58  ;;  %1538 = vbcast.lane.b32.xlu0 %v1487_v59, 256  ;;  %1542 = vbcast.lane.b32.xlu1 %v1487_v59, 264  ;;  %v1491_v0 = vrot.slane %v1490_v61, 2  ;;  %v1715_v6 = vpop.xlane.xlu0 %1714 }
 0x2e1   : > { %v1389_v1 = vmul.f32 %v2356_v48, %v1381_v60  ;;  %v1498_v2 = vrot.slane %v1497_v63, 2  ;;  %v1737_v26 = vmul.f32 %v1715_v6, %v2860_v12 }
 0x2e2   : > { %v1476_v3 = vmul.f32 %v3005_v18, %v1388_v62  ;;  %v1492_v4 = vadd.f32 %v1491_v0, %v1490_v61 }
 0x2e3   : > { %v1477_v5 = vmul.f32 %v3007_v23, %v1389_v1  ;;  %v1499_v7 = vadd.f32 %v1498_v2, %v1497_v63  ;;  %v1745_v12 = vsel %vm417_vm1, %v1737_v26, 0.0 }
 0x2e4   : > { %v2358_v8 = vpop.eup %2357  ;;  %v1493_v9 = vrot.slane %v1492_v4, 1  ;;  %v1502_v10 = vsel %vm1336_vm3, %v1476_v3, 0.0  ;;  %v1746_v51 = vrot.slane %v1745_v12, 4 }
 0x2e5   : > { %v2360_v11 = vpop.eup %2359  ;;  %v1374_v13 = vmul.f32 %v2358_v8, %v1354_v35  ;;  %v1500_v14 = vrot.slane %v1499_v7, 1  ;;  %v1503_v16 = vrot.slane %v1502_v10, 4  ;;  %v1509_v19 = vsel %vm1336_vm3, %v1477_v5, 0.0 }
 0x2e6   : > { %v1375_v22 = vmul.f32 %v2360_v11, %v1357_v34  ;;  %v1494_v27 = vadd.f32 %v1493_v9, %v1492_v4  ;;  %v1510_v18 = vrot.slane %v1509_v19, 4  ;;  %v1747_v0 = vadd.f32 %v1746_v51, %v1745_v12 }
 0x2e7   : > { %v1382_v29 = vsub.f32 2.0, %v1374_v13  ;;  %v1718_v30 = vpop.xlane.xlu1 %1717  ;;  %v1501_v23 = vadd.f32 %v1500_v14, %v1499_v7  ;;  %v1504_v31 = vadd.f32 %v1503_v16, %v1502_v10 }
 0x2e8   : > { %v1383_v32 = vsub.f32 2.0, %v1375_v22  ;;  %v1721_v33 = vpop.xlane.xlu0 %1720  ;;  %v1738_v37 = vmul.f32 %v1718_v30, %v2868_v15  ;;  %1545 = vbcast.lane.b32.xlu1 %v1494_v27, 256  ;;  %v1511_v36 = vadd.f32 %v1510_v18, %v1509_v19  ;;  %v1748_v14 = vrot.slane %v1747_v0, 2 }
 0x2e9   : > { %v1390_v35 = vmul.f32 %v2358_v8, %v1382_v29  ;;  %v1739_v38 = vmul.f32 %v1721_v33, %v2872_v17  ;;  %1552 = vbcast.lane.b32.xlu0 %v1501_v23, 256  ;;  %v1505_v39 = vrot.slane %v1504_v31, 2 }
 0x2ea   : > { %v2362_v34 = vpop.eup %2361  ;;  %v1391_v41 = vmul.f32 %v2360_v11, %v1383_v32  ;;  %v1752_v43 = vsel %vm417_vm1, %v1738_v37, 0.0  ;;  %v1512_v44 = vrot.slane %v1511_v36, 2  ;;  %v1749_v32 = vadd.f32 %v1748_v14, %v1747_v0 }
 0x2eb   : > { %v1478_v49 = vmul.f32 %v3013_v40, %v1390_v35  ;;  %v1376_v45 = vmul.f32 %v2362_v34, %v1360_v52  ;;  %v1759_v46 = vsel %vm417_vm1, %v1739_v38, 0.0  ;;  %v1753_v15 = vrot.slane %v1752_v43, 4 }
 0x2ec   : > { %v1479_v47 = vmul.f32 %v3015_v42, %v1391_v41  ;;  %1549 = vbcast.lane.b32.xlu1 %v1494_v27, 264  ;;  %v1506_v48 = vadd.f32 %v1505_v39, %v1504_v31  ;;  %v1513_v54 = vadd.f32 %v1512_v44, %v1511_v36  ;;  %v1760_v50 = vrot.slane %v1759_v46, 4 }
 0x2ed   : > { %v1384_v17 = vsub.f32 2.0, %v1376_v45  ;;  %v1516_v55 = vsel %vm1336_vm3, %v1478_v49, 0.0  ;;  %v1754_v59 = vadd.f32 %v1753_v15, %v1752_v43 }
 0x2ee   : > { %v1507_v56 = vrot.slane %v1506_v48, 1  ;;  %v1517_v53 = vrot.slane %v1516_v55, 4  ;;  %v1523_v40 = vsel %vm1336_vm3, %v1479_v47, 0.0  ;;  %v1514_v60 = vrot.slane %v1513_v54, 1 }
 0x2ef   : > { %v1392_v58 = vmul.f32 %v2362_v34, %v1384_v17  ;;  %v1524_v42 = vrot.slane %v1523_v40, 4  ;;  %v1761_v3 = vadd.f32 %v1760_v50, %v1759_v46  ;;  %v1755_v7 = vrot.slane %v1754_v59, 2 }
 0x2f0   : > { %v1724_v52 = vpop.xlane.xlu1 %1723  ;;  %v1508_v61 = vadd.f32 %v1507_v56, %v1506_v48  ;;  %1556 = vbcast.lane.b32.xlu1 %v1501_v23, 264  ;;  %v1518_v63 = vadd.f32 %v1517_v53, %v1516_v55  ;;  %v1515_v13 = vadd.f32 %v1514_v60, %v1513_v54  ;;  %v1750_v46 = vrot.slane %v1749_v32, 1 }
 0x2f1   : > { %v1480_v62 = vmul.f32 %v3021_v57, %v1392_v58  ;;  %v1727_v1 = vpop.xlane.xlu0 %1726  ;;  %v1740_v2 = vmul.f32 %v1724_v52, %v2883_v20  ;;  %v1525_v6 = vadd.f32 %v1524_v42, %v1523_v40  ;;  %v1762_v22 = vrot.slane %v1761_v3, 2 }
 0x2f2   : > { %v1741_v4 = vmul.f32 %v1727_v1, %v2886_v21  ;;  %1559 = vbcast.lane.b32.xlu0 %v1508_v61, 256  ;;  %v1519_v5 = vrot.slane %v1518_v63, 2  ;;  %v1756_v27 = vadd.f32 %v1755_v7, %v1754_v59  ;;  %v1751_v59 = vadd.f32 %v1750_v46, %v1749_v32 }
 0x2f3   : > { %v1766_v8 = vsel %vm417_vm1, %v1740_v2, 0.0  ;;  %v1530_v9 = vsel %vm1336_vm3, %v1480_v62, 0.0  ;;  %v1526_v20 = vrot.slane %v1525_v6, 2  ;;  %v1763_v35 = vadd.f32 %v1762_v22, %v1761_v3 }
 0x2f4   : > { %v1773_v10 = vsel %vm417_vm1, %v1741_v4, 0.0  ;;  %v1767_v11 = vrot.slane %v1766_v8, 4  ;;  %1563 = vbcast.lane.b32.xlu1 %v1508_v61, 264  ;;  %v1520_v57 = vadd.f32 %v1519_v5, %v1518_v63  ;;  %v1531_v19 = vrot.slane %v1530_v9, 4 }
 0x2f5   : > { %v1774_v16 = vrot.slane %v1773_v10, 4  ;;  %v1527_v29 = vadd.f32 %v1526_v20, %v1525_v6  ;;  %v1757_v41 = vrot.slane %v1756_v27, 1  ;;  %v1764_v17 = vrot.slane %v1763_v35, 1 }
 0x2f6   : > { %v1768_v21 = vadd.f32 %v1767_v11, %v1766_v8  ;;  %1566 = vbcast.lane.b32.xlu0 %v1515_v13, 256  ;;  %v1521_v26 = vrot.slane %v1520_v57, 1  ;;  %v1532_v30 = vadd.f32 %v1531_v19, %v1530_v9 }
 0x2f7   : > { %v1775_v18 = vadd.f32 %v1774_v16, %v1773_v10  ;;  %v1528_v37 = vrot.slane %v1527_v29, 1  ;;  %v1765_v52 = vadd.f32 %v1764_v17, %v1763_v35 }
 0x2f8   : > { %v1769_v23 = vrot.slane %v1768_v21, 2  ;;  %v1522_v31 = vadd.f32 %v1521_v26, %v1520_v57  ;;  %1570 = vbcast.lane.b32.xlu1 %v1515_v13, 264  ;;  %v1533_v36 = vrot.slane %v1532_v30, 2 }
 0x2f9   : > { %v1730_v33 = vpop.xlane.xlu1 %1729  ;;  %v1776_v38 = vrot.slane %v1775_v18, 2  ;;  %v1529_v45 = vadd.f32 %v1528_v37, %v1527_v29 }
 0x2fa   : > { %v1733_v39 = vpop.xlane.xlu0 %1732  ;;  %v1742_v34 = vmul.f32 %v1730_v33, %v2897_v24  ;;  %1573 = vbcast.lane.b32.xlu0 %v1522_v31, 256  ;;  %v1770_v12 = vadd.f32 %v1769_v23, %v1768_v21  ;;  %v1534_v44 = vadd.f32 %v1533_v36, %v1532_v30  ;;  %v1758_v24 = vadd.f32 %v1757_v41, %v1756_v27 }
 0x2fb   : > { %v1743_v43 = vmul.f32 %v1733_v39, %v2900_v25  ;;  %v1777_v51 = vadd.f32 %v1776_v38, %v1775_v18 }
 0x2fc   : > { %v1780_v49 = vsel %vm417_vm1, %v1742_v34, 0.0  ;;  %1577 = vbcast.lane.b32.xlu1 %v1522_v31, 264  ;;  %v1535_v48 = vrot.slane %v1534_v44, 1  ;;  %v1771_v55 = vrot.slane %v1770_v12, 1  ;;  %v1809_v42 = vsel %vm1689_vm4, %v1758_v24, %v1751_v59 }
 0x2fd   : > { %v1787_v15 = vsel %vm417_vm1, %v1743_v43, 0.0  ;;  %v1781_v47 = vrot.slane %v1780_v49, 4  ;;  %v1778_v61 = vrot.slane %v1777_v51, 1  ;;  %v1810_v5 = vsel %vm1691_vm5, %v1765_v52, %v1809_v42 }
 0x2fe   : > { %v1788_v54 = vrot.slane %v1787_v15, 4  ;;  %1580 = vbcast.lane.b32.xlu0 %v1529_v45, 256  ;;  %v1536_v53 = vadd.f32 %v1535_v48, %v1534_v44  ;;  %v1772_v62 = vadd.f32 %v1771_v55, %v1770_v12 }
 0x2ff   : > { %v1782_v50 = vadd.f32 %v1781_v47, %v1780_v49  ;;  %v1736_v56 = vpop.xlane.xlu1 %1735  ;;  %v1779_v4 = vadd.f32 %v1778_v61, %v1777_v51 }
 0x300   : > { %v1789_v25 = vadd.f32 %v1788_v54, %v1787_v15  ;;  %v1744_v58 = vmul.f32 %v1736_v56, %v2911_v28  ;;  %1584 = vbcast.lane.b32.xlu1 %v1529_v45, 264  ;;  %v1811_v7 = vsel %vm1693_vm6, %v1772_v62, %v1810_v5 }
 0x301   : > { %v1783_v40 = vrot.slane %v1782_v50, 2  ;;  %v1812_v13 = vsel %vm1695_vm7, %v1779_v4, %v1811_v7 }
 0x302   : > { %v1790_v60 = vrot.slane %v1789_v25, 2  ;;  %v1794_v63 = vsel %vm417_vm1, %v1744_v58, 0.0  ;;  %1587 = vbcast.lane.b32.xlu0 %v1536_v53, 256 }
 0x303   : > { %v1784_v0 = vadd.f32 %v1783_v40, %v1782_v50  ;;  %v1795_v1 = vrot.slane %v1794_v63, 4 }
 0x304   : > { %v1791_v2 = vadd.f32 %v1790_v60, %v1789_v25  ;;  %1591 = vbcast.lane.b32.xlu1 %v1536_v53, 264 }
 0x305   : > { %v1785_v28 = vrot.slane %v1784_v0, 1  ;;  %v1796_v3 = vadd.f32 %v1795_v1, %v1794_v63 }
 0x306   : > { %v1792_v6 = vrot.slane %v1791_v2, 1 }
 0x307   : > { %v1786_v8 = vadd.f32 %v1785_v28, %v1784_v0  ;;  %v1797_v9 = vrot.slane %v1796_v3, 2 }
 0x308   : > { %v1793_v11 = vadd.f32 %v1792_v6, %v1791_v2 }
 0x309   : > { %v1798_v10 = vadd.f32 %v1797_v9, %v1796_v3  ;;  %v1813_v57 = vsel %vm1697_vm8, %v1786_v8, %v1812_v13 }
 0x30a   : > { %v1814_v20 = vsel %vm1699_vm9, %v1793_v11, %v1813_v57 }
 0x30b   : > { %v1799_v14 = vrot.slane %v1798_v10, 1 }
 0x30d   : > { %v1800_v16 = vadd.f32 %v1799_v14, %v1798_v10 }
 0x30f   : > { %v1815_v19 = vsel %vm1701_vm10, %v1800_v16, %v1814_v20 }
 0x310   : > { %1817 = vst.msk [vmem:[%s377_s19] sm:$0xff] %vm417_vm1, %v1815_v19 }
 0x311   : > { %2500 = shalt.err (!%p2497_p4)
}
 0x312   : > { %s2501_s12 = scalar_lea.hbm %s3088_s14, 128  ;;  %s2505_s18 = scalar_lea.hbm %s3200_s7, 256 }
 0x313   : > { %p2502_p5 = scmp.ne.s32.totalorder %s3088_s14, %s2501_s12  ;;  %p2506_p2 = scmp.lt.s32.totalorder %s3088_s14, %s3200_s7 }
 0x314   : > { %p2507_p6 = scmp.lt.s32.totalorder %s2505_s18, %s2501_s12 }
 0x315   : > { %p2503_p7 = pnand %p2502_p5, %p3232_p10 }
 0x316   : > { %p2508_p12 = por %p2507_p6, %p2506_p2 }
 0x317   : > { %p2504_p8 = pneg %p2503_p7 }
 0x319   : > { %p2509_p0 = pnand %p2508_p12, %p2504_p8 }
 0x31b   : > { %2512 = shalt.err (!%p2509_p0)
}
 0x31c   : > { %2231 = dma.vmem_to_hbm [thread:$0]  (%p3232_p10), %s1851_s4, 128, %s3088_s14, %s1824_s15   ;;  %v2363_v29 = vld [vmem:[%s2841_s29 + $0x18] sm:$0xff]  ;;  %v2364_v23 = vld [vmem:[%s2841_s29] sm:$0xff]  ;;  %v2365_v32 = vld [vmem:[%s2841_s29 + $0x8] sm:$0xff] }
 0x31d   : > { %v2366_v37 = vld [vmem:[%s2841_s29 + $0x10] sm:$0xff]  ;;  %v2367_v35 = vld [vmem:[%s2841_s29 + $0x20] sm:$0xff]  ;;  %v2368_v41 = vld [vmem:[%s2841_s29 + $0x28] sm:$0xff]  ;;  %s3154_s14 = scalar_lea.hbm %s3199_s6, %s2041_s13  ;;  %s2604_s17 = smov [#allocation10]  }
 0x31e   : > { %v2369_v46 = vld [vmem:[%s2841_s29 + $0x30] sm:$0xff]  ;;  %v2370_v24 = vld [vmem:[%s2841_s29 + $0x38] sm:$0xff]  ;;  %v2371_v25 = vld [vmem:[%s2841_s29 + $0x40] sm:$0xff]  ;;  %s2517_s20 = sshll.u32 %s2604_s17, 4  ;;  %s2518_s20 = int_to_ptr.vmem [resolvable:$false] %s2517_s20 }
 0x31f   : > { %v2372_v63 = vld [vmem:[%s2841_s29 + $0x48] sm:$0xff]  ;;  %v2373_v28 = vld [vmem:[%s2841_s29 + $0x50] sm:$0xff]  ;;  %v2374_v9 = vld [vmem:[%s2841_s29 + $0x58] sm:$0xff]  ;;  %s2519_s28 = scalar_lea.vmem %s2518_s20, 256 }
 0x320   : > { %v2375_v20 = vld [vmem:[%s2841_s29 + $0x60] sm:$0xff] }
 0x352   : > { %v1543_v22 = vpop.permute.xlu1 %1542  ;;  %v1539_v26 = vpop.permute.xlu0 %1538 }
 0x353   : > { %v1593_v31 = vmul.f32 %v2364_v23, %v1539_v26  ;;  %v1594_v33 = vmul.f32 %v2365_v32, %v1543_v22 }
 0x355   : > { %v1609_v43 = vsel %vm558_vm0, %v1593_v31, 0.0  ;;  %v1610_v49 = vsel %vm558_vm0, %v1594_v33, 0.0 }
 0x356   : > { %v1611_v50 = vadd.f32 %v1610_v49, %v1609_v43 }
 0x358   : > { %v1612_v62 = vrot.slane %v1611_v50, 4 }
 0x35a   : > { %v1546_v21 = vpop.permute.xlu1 %1545  ;;  %v1613_v11 = vadd.f32 %v1612_v62, %v1611_v50 }
 0x35b   : > { %v1553_v18 = vpop.permute.xlu0 %1552  ;;  %v1595_v36 = vmul.f32 %v2366_v37, %v1546_v21 }
 0x35c   : > { %v1597_v38 = vmul.f32 %v2367_v35, %v1553_v18  ;;  %v1614_v31 = vrot.slane %v1613_v11, 2 }
 0x35d   : > { %v1618_v45 = vsel %vm558_vm0, %v1595_v36, 0.0 }
 0x35e   : > { %v1550_v27 = vpop.permute.xlu1 %1549  ;;  %v1627_v48 = vsel %vm558_vm0, %v1597_v38, 0.0  ;;  %v2377_v38 = vld [vmem:[%s2841_s29 + $0x70] sm:$0xff] }
 0x35f   : > { %v1596_v30 = vmul.f32 %v2363_v29, %v1550_v27 }
 0x361   : > { %v1619_v34 = vsel %vm558_vm0, %v1596_v30, 0.0  ;;  %v2376_v30 = vld [vmem:[%s2841_s29 + $0x68] sm:$0xff] }
 0x362   : > { %v1557_v39 = vpop.permute.xlu1 %1556  ;;  %v1620_v17 = vadd.f32 %v1619_v34, %v1618_v45  ;;  %v2378_v45 = vld [vmem:[%s2841_s29 + $0x78] sm:$0xff]  ;;  %s370_s29 = scalar_lea.vmem [#allocation10], %s2011_s22  ;;  %s1819_s22 = scalar_lea.sflag [#allocation4], %s2829_s26 }
 0x363   : > { %v1598_v12 = vmul.f32 %v2368_v41, %v1557_v39  ;;  %s1837_s4 = sshll.u32 %s370_s29, 4  ;;  %s1838_s4 = int_to_ptr.vmem [resolvable:$true] %s1837_s4 }
 0x364   : > { %v1560_v44 = vpop.permute.xlu0 %1559  ;;  %v1621_v40 = vrot.slane %v1620_v17, 4  ;;  %s2513_s15 = scalar_lea.vmem %s1838_s4, 128  ;;  %p2520_p13 = scmp.lt.s32.totalorder %s1838_s4, %s2518_s20 }
 0x365   : > { %v1599_v15 = vmul.f32 %v2369_v46, %v1560_v44  ;;  %v1628_v47 = vsel %vm558_vm0, %v1598_v12, 0.0  ;;  %p2514_p3 = scmp.ne.s32.totalorder %s1838_s4, %s2513_s15  ;;  %p2521_p1 = scmp.lt.s32.totalorder %s2519_s28, %s2513_s15 }
 0x366   : > { %v1564_v51 = vpop.permute.xlu1 %1563  ;;  %v1629_v54 = vadd.f32 %v1628_v47, %v1627_v48  ;;  %v1622_v5 = vadd.f32 %v1621_v40, %v1620_v17 }
 0x367   : > { %v1600_v55 = vmul.f32 %v2370_v24, %v1564_v51  ;;  %v1636_v53 = vsel %vm558_vm0, %v1599_v15, 0.0  ;;  %v1615_v15 = vadd.f32 %v1614_v31, %v1613_v11  ;;  %p2515_p11 = pnand %p2514_p3, %p3232_p10  ;;  %p2522_p4 = por %p2521_p1, %p2520_p13 }
 0x368   : > { %v1567_v56 = vpop.permute.xlu0 %1566  ;;  %v1630_v60 = vrot.slane %v1629_v54, 4  ;;  %v1623_v21 = vrot.slane %v1622_v5, 2 }
 0x369   : > { %v1601_v58 = vmul.f32 %v2371_v25, %v1567_v56  ;;  %v1637_v59 = vsel %vm558_vm0, %v1600_v55, 0.0  ;;  %p2516_p9 = pneg %p2515_p11 }
 0x36a   : > { %v1638_v52 = vadd.f32 %v1637_v59, %v1636_v53  ;;  %v1571_v61 = vpop.permute.xlu1 %1570  ;;  %v1631_v8 = vadd.f32 %v1630_v60, %v1629_v54  ;;  %v1624_v41 = vadd.f32 %v1623_v21, %v1622_v5 }
 0x36b   : > { %v1602_v42 = vmul.f32 %v2372_v63, %v1571_v61  ;;  %v1645_v2 = vsel %vm558_vm0, %v1601_v58, 0.0  ;;  %v1616_v58 = vrot.slane %v1615_v15, 1  ;;  %p2523_p5 = pnand %p2522_p4, %p2516_p9 }
 0x36c   : > { %v1639_v0 = vrot.slane %v1638_v52, 4  ;;  %v1574_v1 = vpop.permute.xlu0 %1573  ;;  %v1632_v29 = vrot.slane %v1631_v8, 2  ;;  %v1625_v55 = vrot.slane %v1624_v41, 1 }
 0x36d   : > { %v1603_v3 = vmul.f32 %v2373_v28, %v1574_v1  ;;  %v1646_v4 = vsel %vm558_vm0, %v1602_v42, 0.0  ;;  %v1617_v1 = vadd.f32 %v1616_v58, %v1615_v15 }
 0x36e   : > { %v1647_v6 = vadd.f32 %v1646_v4, %v1645_v2  ;;  %v1578_v7 = vpop.permute.xlu1 %1577  ;;  %v1640_v13 = vadd.f32 %v1639_v0, %v1638_v52  ;;  %v1633_v49 = vadd.f32 %v1632_v29, %v1631_v8  ;;  %v1626_v60 = vadd.f32 %v1625_v55, %v1624_v41 }
 0x36f   : > { %v1604_v10 = vmul.f32 %v2374_v9, %v1578_v7  ;;  %v1654_v16 = vsel %vm558_vm0, %v1603_v3, 0.0 }
 0x370   : > { %v1648_v57 = vrot.slane %v1647_v6, 4  ;;  %v1581_v14 = vpop.permute.xlu0 %1580  ;;  %v1641_v32 = vrot.slane %v1640_v13, 2  ;;  %v1634_v25 = vrot.slane %v1633_v49, 1  ;;  %v1690_v5 = vsel %vm1689_vm4, %v1626_v60, %v1617_v1 }
 0x371   : > { %v1605_v19 = vmul.f32 %v2375_v20, %v1581_v14  ;;  %v1655_v22 = vsel %vm558_vm0, %v1604_v10, 0.0 }
 0x372   : > { %v1649_v26 = vadd.f32 %v1648_v57, %v1647_v6  ;;  %v1656_v27 = vadd.f32 %v1655_v22, %v1654_v16  ;;  %v1585_v18 = vpop.permute.xlu1 %1584  ;;  %v1642_v47 = vadd.f32 %v1641_v32, %v1640_v13  ;;  %v1635_v0 = vadd.f32 %v1634_v25, %v1633_v49 }
 0x373   : > { %v1606_v23 = vmul.f32 %v2376_v30, %v1585_v18  ;;  %v1663_v35 = vsel %vm558_vm0, %v1605_v19, 0.0 }
 0x374   : > { %v1657_v33 = vrot.slane %v1656_v27, 4  ;;  %v1588_v37 = vpop.permute.xlu0 %1587  ;;  %v1650_v36 = vrot.slane %v1649_v26, 2  ;;  %v1643_v59 = vrot.slane %v1642_v47, 1  ;;  %v1692_v8 = vsel %vm1691_vm5, %v1635_v0, %v1690_v5 }
 0x375   : > { %v1607_v39 = vmul.f32 %v2377_v38, %v1588_v37  ;;  %v1664_v34 = vsel %vm558_vm0, %v1606_v23, 0.0 }
 0x376   : > { %v1658_v12 = vadd.f32 %v1657_v33, %v1656_v27  ;;  %v1665_v43 = vadd.f32 %v1664_v34, %v1663_v35  ;;  %v1592_v44 = vpop.permute.xlu1 %1591  ;;  %v1651_v51 = vadd.f32 %v1650_v36, %v1649_v26  ;;  %v1644_v2 = vadd.f32 %v1643_v59, %v1642_v47 }
 0x377   : > { %v1608_v46 = vmul.f32 %v2378_v45, %v1592_v44  ;;  %v1672_v54 = vsel %vm558_vm0, %v1607_v39, 0.0 }
 0x378   : > { %v1659_v48 = vrot.slane %v1658_v12, 2  ;;  %v1666_v17 = vrot.slane %v1665_v43, 4  ;;  %v1652_v61 = vrot.slane %v1651_v51, 1  ;;  %v1694_v10 = vsel %vm1693_vm6, %v1644_v2, %v1692_v8 }
 0x379   : > { %v1673_v24 = vsel %vm558_vm0, %v1608_v46, 0.0 }
 0x37a   : > { %v1660_v50 = vadd.f32 %v1659_v48, %v1658_v12  ;;  %v1667_v56 = vadd.f32 %v1666_v17, %v1665_v43  ;;  %v1674_v53 = vadd.f32 %v1673_v24, %v1672_v54  ;;  %v1653_v4 = vadd.f32 %v1652_v61, %v1651_v51 }
 0x37c   : > { %v1668_v40 = vrot.slane %v1667_v56, 2  ;;  %v1675_v52 = vrot.slane %v1674_v53, 4  ;;  %v1661_v63 = vrot.slane %v1660_v50, 1  ;;  %v1696_v13 = vsel %vm1695_vm7, %v1653_v4, %v1694_v10 }
 0x37e   : > { %v1669_v42 = vadd.f32 %v1668_v40, %v1667_v56  ;;  %v1676_v62 = vadd.f32 %v1675_v52, %v1674_v53  ;;  %v1662_v6 = vadd.f32 %v1661_v63, %v1660_v50 }
 0x380   : > { %v1670_v28 = vrot.slane %v1669_v42, 1  ;;  %v1677_v3 = vrot.slane %v1676_v62, 2  ;;  %v1698_v57 = vsel %vm1697_vm8, %v1662_v6, %v1696_v13 }
 0x382   : > { %v1678_v7 = vadd.f32 %v1677_v3, %v1676_v62  ;;  %v1671_v9 = vadd.f32 %v1670_v28, %v1669_v42 }
 0x384   : > { %v1679_v11 = vrot.slane %v1678_v7, 1  ;;  %v1700_v16 = vsel %vm1699_vm9, %v1671_v9, %v1698_v57 }
 0x386   : > { %v1680_v14 = vadd.f32 %v1679_v11, %v1678_v7 }
 0x388   : > { %v1702_v20 = vsel %vm1701_vm10, %v1680_v14, %v1700_v16 }
 0x389   : > { %1704 = vst.msk [vmem:[%s370_s29] sm:$0xff] %vm558_vm0, %v1702_v20 }
 0x38a   : > { %2526 = shalt.err (!%p2523_p5)
}
 0x38b   : > { %s2527_s13 = scalar_lea.hbm %s3154_s14, 128  ;;  %s2531_s9 = scalar_lea.hbm %s3199_s6, 256 }
 0x38c   : > { %p2528_p7 = scmp.ne.s32.totalorder %s3154_s14, %s2527_s13  ;;  %p2532_p6 = scmp.lt.s32.totalorder %s3154_s14, %s3199_s6 }
 0x38d   : > { %p2533_p12 = scmp.lt.s32.totalorder %s2531_s9, %s2527_s13 }
 0x38e   : > { %p2529_p8 = pnand %p2528_p7, %p3232_p10 }
 0x38f   : > { %p2534_p0 = por %p2533_p12, %p2532_p6 }
 0x390   : > { %p2530_p2 = pneg %p2529_p8 }
 0x392   : > { %p2535_p3 = pnand %p2534_p0, %p2530_p2 }
 0x394   : > { %2538 = shalt.err (!%p2535_p3)
}
 0x395   : > { %2230 = dma.vmem_to_hbm [thread:$0]  (%p3232_p10), %s1838_s4, 128, %s3154_s14, %s1819_s22  }
 0x396 PF: > { %s1862_s2 = sand.u32 1, %s2581_s24   ;;  %p3233_p11 = scmp.ne.s32.totalorder %s3214_s8, 0 }
 0x397   : > { %p3234_p9 = scmp.ge.s32.totalorder %s2593_s27, 2  ;;  %s1863_s18 = scalar_lea.sflag [#allocation4], %s1862_s2 }
 0x399   : > { %p2249_p13 = pnand %p3234_p9, %p3233_p11 }
 0x39b   : > { %p2250_p1 = pneg %p2249_p13 }
 0x39d   : > { %2572 = dma.done.wait (%p2250_p1), %s1863_s18, 128  }
 0x39e   : > { %2574 = vsyncadd (%p2250_p1), %s1863_s18, 4294967168  ;;  %s1872_s10 = scalar_lea.sflag [#allocation12], %s1862_s2 }
 0x39f   : > { %2576 = dma.done.wait (%p2250_p1), %s1872_s10, 128  }
 0x3a0   : > { %2578 = vsyncadd (%p2250_p1), %s1872_s10, 4294967168  ;;  %s3235_s11 = sld [smem:[#allocation19_spill]]  ;;  %p28_p10 = scmp.ge.s32.totalorder %s2723_s23, 4  }
 0x3a1   : > { %s3236_s26 = sld [smem:[#allocation20_spill]]  ;;  %s3237_s24 = smov %s2585_s25 }
 0x3a2   : > { %s3239_s27 = smov %s2723_s23  ;;  %30 = sbr.rel (!%p28_p10) target bundleno = 14 (0xe), region = 127 }
 0x3a6   : > { %s3238_s25 = smov %s3235_s11 }
 0x3a7   :  { %1877 = vsyncpa [#allocation3], 1 }
 0x3a8   :  { %1879 = vsyncpa [#allocation3 + $0x1], 1 }
 0x3a9   :  { %1880 = vsyncpa [#allocation6], 1 }
 0x3aa   :  { %1882 = vsyncpa [#allocation6 + $0x1], 1 }
 0x3ab   :  { %1883 = vsyncpa [#allocation9], 1 }
 0x3ac   :  { %1884 = vsyncpa [#allocation4], 1 }
 0x3ad   :  { %1886 = vsyncpa [#allocation4 + $0x1], 1 }
 0x3ae   :  { %1887 = vsyncpa [#allocation12], 1 }
 0x3af   :  { %1889 = vsyncpa [#allocation12 + $0x1], 1 }

</bundles_post_ra>
